<compile_context>
chip_gen: v6e
topology: v6e:2x2x1
jax: 0.10.0
libtpu: 0.0.40
codegen_flags: <defaults>
</compile_context>

<pallas_src>
import math

import jax
import jax.numpy as jnp
from jax.experimental import pallas as pl
from jax.experimental.pallas import tpu as pltpu

# ---- windowing constants (identical math to the module's __init__) ----------
EPS = 1.0 / 255.0
UE = math.log(1.0 / EPS - 1.0)

W0 = 2.0 / 80.0 * UE
B0 = -2.0 * 40.0 / 80.0 * UE
W1 = 2.0 / 200.0 * UE
B1 = -2.0 * 80.0 / 200.0 * UE
W2 = 2.0 / 2000.0 * UE
B2 = -2.0 * 600.0 / 2000.0 * UE


def _sigmoid_window_kernel(scal_ref, x_ref, o_ref):
    """Elementwise hot path on one row-tile of one slice.

    scal_ref (SMEM, f32[6]): [a0, c0, a1, c1, a2, c2] with
        a_i = 0.5 * W_i * slope,  c_i = 0.5 * (W_i * intercept + B_i)
    x_ref  (VMEM): (tile_h, W) raw pixels (any int/float dtype)
    o_ref  (VMEM): (3, tile_h, W) fused channel output (f32 or bf16)
    """
    # Hoist the six scalar (SMEM) reads once, before the broadcasts.
    a0 = scal_ref[0]
    c0 = scal_ref[1]
    a1 = scal_ref[2]
    c1 = scal_ref[3]
    a2 = scal_ref[4]
    c2 = scal_ref[5]

    x = x_ref[...].astype(jnp.float32)
    out_dt = o_ref.dtype
    # sigmoid(z) == 0.5 * tanh(z/2) + 0.5  (tanh runs on the EUP slot)
    o_ref[0] = (0.5 * jnp.tanh(a0 * x + c0) + 0.5).astype(out_dt)
    o_ref[1] = (0.5 * jnp.tanh(a1 * x + c1) + 0.5).astype(out_dt)
    o_ref[2] = (0.5 * jnp.tanh(a2 * x + c2) + 0.5).astype(out_dt)


def _default_tile_h():
    """Per-generation default: 256 on v6e (grid=2 balanced for a single TC),
    128 elsewhere (v7x: >=2 steps per TensorCore; v5e: smaller exposed
    last-tile writeback)."""
    try:
        kind = jax.devices()[0].device_kind.lower()
    except Exception:  # pragma: no cover - defensive
        return 128
    if "v6" in kind:
        return 256
    return 128


def sigmoid_windowing(pixel_array, rescale_slope, rescale_intercept, *,
                      tile_h=None, out_dtype=jnp.float32, channels_last=False):
    """Sigmoid-window a CT slice (or a batch of slices).

    pixel_array: (H, W) or (N, H, W), any integer/float dtype (native int16
        is ideal: halves the HBM read).
    Returns:
        channels_last=False (default): (3, H, W) / (N, 3, H, W), `out_dtype`.
        channels_last=True:            (H, W, 3) / (N, H, W, 3) — the torch
            module's layout; costs one extra XLA transpose pass.
    """
    squeeze_batch = False
    if pixel_array.ndim == 2:
        pixel_array = pixel_array[None]
        squeeze_batch = True
    N, H, W = pixel_array.shape

    if tile_h is None:
        tile_h = _default_tile_h()
    tile_h = min(tile_h, H)

    # Sublane alignment for the input dtype: 8 rows per 32-bit sublane tile,
    # 16 for 16-bit inputs, 32 for 8-bit inputs.
    itemsize = jnp.dtype(pixel_array.dtype).itemsize
    sublane = max(8, 8 * (4 // max(itemsize, 1)))
    assert tile_h % sublane == 0, (
        f"tile_h={tile_h} must be a multiple of {sublane} for dtype "
        f"{pixel_array.dtype}")
    assert H % tile_h == 0, "H must be a multiple of tile_h"
    assert W % 128 == 0, "W must be a multiple of 128 (lane-dense tiles)"

    # Fold RescaleSlope/Intercept (and the tanh 1/2 factor) into the window
    # affine once, on the scalar side:  z_i = a_i * x + c_i.
    slope = jnp.asarray(rescale_slope, jnp.float32)
    inter = jnp.asarray(rescale_intercept, jnp.float32)
    w = jnp.array([W0, W1, W2], jnp.float32)
    b = jnp.array([B0, B1, B2], jnp.float32)
    scalars = jnp.stack([0.5 * w * slope, 0.5 * (w * inter + b)],
                        axis=-1).reshape(6)

    out = pl.pallas_call(
        _sigmoid_window_kernel,
        out_shape=jax.ShapeDtypeStruct((N, 3, H, W), out_dtype),
        grid_spec=pl.GridSpec(
            grid=(N, H // tile_h),
            in_specs=[
                pl.BlockSpec(memory_space=pltpu.SMEM),      # 6 folded scalars
                # slice-n, row-tile i of the raw pixel plane (batch squeezed)
                pl.BlockSpec((None, tile_h, W), lambda n, i: (n, i, 0)),
            ],
            # fused lane-dense (3, tile_h, W) output block (batch squeezed)
            out_specs=pl.BlockSpec((None, 3, tile_h, W),
                                   lambda n, i: (n, 0, i, 0)),
        ),
        compiler_params=pltpu.CompilerParams(
            dimension_semantics=("parallel", "parallel"),
        ),
    )(scalars, pixel_array)

    if channels_last:
        # torch.cat((y0, y1, y2), 2) -> channel-last; single XLA transpose
        # moving the kernel's output dtype (bf16 if requested).
        # Normalize(mean=[0,0,0], std=[1,1,1]) is the identity -> no-op.
        out = jnp.transpose(out, (0, 2, 3, 1))
    if squeeze_batch:
        out = out[0]
    return out


def _reference(pixel_array, slope, intercept):
    """Pure-JAX reference with the module's exact formula (exp form, no folding).

    Returns channel-last (..., H, W, 3) float32."""
    y = pixel_array.astype(jnp.float32) * slope + intercept
    y0 = 1.0 / (1.0 + jnp.exp(-(W0 * y + B0)))
    y1 = 1.0 / (1.0 + jnp.exp(-(W1 * y + B1)))
    y2 = 1.0 / (1.0 + jnp.exp(-(W2 * y + B2)))
    return jnp.stack([y0, y1, y2], axis=-1)


if __name__ == "__main__":
    key = jax.random.PRNGKey(0)
    N, H, W = 2, 512, 512  # module hardcodes self.vdim = (512, 512, -1)
    # Synthetic CT-like stored pixel values (DICOM planes are natively int16).
    pixels = jax.random.randint(key, (N, H, W), minval=0, maxval=4096,
                                dtype=jnp.int32).astype(jnp.int16)
    rescale_slope = 1.0
    rescale_intercept = -1024.0  # typical CT RescaleIntercept

    ref = _reference(pixels, rescale_slope, rescale_intercept)   # (N, H, W, 3) f32
    ref_nchw = jnp.transpose(ref, (0, 3, 1, 2))                  # (N, 3, H, W)

    # 1) Default fast path: batched, fused (N, 3, H, W) float32, no transpose.
    out = jax.block_until_ready(
        sigmoid_windowing(pixels, rescale_slope, rescale_intercept))
    assert out.shape == (N, 3, H, W), out.shape
    assert jnp.allclose(out, ref_nchw, atol=5e-5, rtol=1e-5), "f32 NCHW mismatch"

    # 2) Module-contract path: single slice, channel-last (512, 512, 3) f32.
    out_hw3 = jax.block_until_ready(
        sigmoid_windowing(pixels[0], rescale_slope, rescale_intercept,
                          channels_last=True))
    assert out_hw3.shape == (H, W, 3), out_hw3.shape
    assert jnp.allclose(out_hw3, ref[0], atol=5e-5, rtol=1e-5), "HWC mismatch"

    # 3) Optional bf16 output (halves the dominant HBM writeback).
    out_bf16 = jax.block_until_ready(
        sigmoid_windowing(pixels, rescale_slope, rescale_intercept,
                          out_dtype=jnp.bfloat16))
    assert out_bf16.shape == (N, 3, H, W), out_bf16.shape
    assert out_bf16.dtype == jnp.bfloat16
    assert jnp.allclose(out_bf16.astype(jnp.float32), ref_nchw,
                        atol=4e-3, rtol=4e-3), "bf16 NCHW mismatch"

    print("KERNEL_OK")
</pallas_src>

<mosaic_0001>
module attributes {stable_mosaic.version = 11 : i64} {
  func.func @_sigmoid_window_kernel(%arg0: i32, %arg1: i32, %arg2: memref<6xf32, #tpu.memory_space<smem>>, %arg3: memref<1x128x512xi16, #tpu.memory_space<vmem>>, %arg4: memref<1x3x128x512xf32, #tpu.memory_space<vmem>>) attributes {dimension_semantics = [#tpu.dimension_semantics<parallel>, #tpu.dimension_semantics<parallel>], iteration_bounds = array<i64: 2, 4>, scalar_prefetch = 0 : i64, scratch_operands = 0 : i64, tpu.core_type = #tpu.core_type<tc>, window_params = [{transform_indices = @transform_0, window_bounds = array<i64: 6>}, {transform_indices = @transform_1, window_bounds = array<i64: 1, 128, 512>}, {transform_indices = @transform_2, window_bounds = array<i64: 1, 3, 128, 512>}]} {
    %c0 = arith.constant 0 : index
    %0 = memref.load %arg2[%c0] : memref<6xf32, #tpu.memory_space<smem>>
    %c1 = arith.constant 1 : index
    %1 = memref.load %arg2[%c1] : memref<6xf32, #tpu.memory_space<smem>>
    %c2 = arith.constant 2 : index
    %2 = memref.load %arg2[%c2] : memref<6xf32, #tpu.memory_space<smem>>
    %c3 = arith.constant 3 : index
    %3 = memref.load %arg2[%c3] : memref<6xf32, #tpu.memory_space<smem>>
    %c4 = arith.constant 4 : index
    %4 = memref.load %arg2[%c4] : memref<6xf32, #tpu.memory_space<smem>>
    %c5 = arith.constant 5 : index
    %5 = memref.load %arg2[%c5] : memref<6xf32, #tpu.memory_space<smem>>
    %c0_0 = arith.constant 0 : index
    %c0_1 = arith.constant 0 : index
    %c0_2 = arith.constant 0 : index
    %6 = vector.load %arg3[%c0_0, %c0_1, %c0_2] : memref<1x128x512xi16, #tpu.memory_space<vmem>>, vector<1x128x512xi16>
    %7 = vector.shape_cast %6 : vector<1x128x512xi16> to vector<128x512xi16>
    %8 = arith.sitofp %7 : vector<128x512xi16> to vector<128x512xf32>
    %9 = vector.broadcast %0 : f32 to vector<128x512xf32>
    %10 = arith.mulf %9, %8 : vector<128x512xf32>
    %11 = vector.broadcast %1 : f32 to vector<128x512xf32>
    %12 = arith.addf %10, %11 : vector<128x512xf32>
    %13 = math.tanh %12 : vector<128x512xf32>
    %cst = arith.constant 5.000000e-01 : f32
    %14 = vector.broadcast %cst : f32 to vector<128x512xf32>
    %15 = arith.mulf %14, %13 : vector<128x512xf32>
    %cst_3 = arith.constant 5.000000e-01 : f32
    %16 = vector.broadcast %cst_3 : f32 to vector<128x512xf32>
    %17 = arith.addf %15, %16 : vector<128x512xf32>
    %c0_4 = arith.constant 0 : index
    %c0_5 = arith.constant 0 : index
    %c0_6 = arith.constant 0 : index
    %c0_7 = arith.constant 0 : index
    %18 = vector.load %arg4[%c0_4, %c0_5, %c0_6, %c0_7] : memref<1x3x128x512xf32, #tpu.memory_space<vmem>>, vector<1x1x128x512xf32>
    %19 = vector.shape_cast %18 : vector<1x1x128x512xf32> to vector<128x512xf32>
    %20 = vector.shape_cast %17 : vector<128x512xf32> to vector<1x1x128x512xf32>
    tpu.vector_store %arg4[%c0_4, %c0_5, %c0_6, %c0_7], %20 {strides = array<i32>} : memref<1x3x128x512xf32, #tpu.memory_space<vmem>>, vector<1x1x128x512xf32>,
    %21 = vector.broadcast %2 : f32 to vector<128x512xf32>
    %22 = arith.mulf %21, %8 : vector<128x512xf32>
    %23 = vector.broadcast %3 : f32 to vector<128x512xf32>
    %24 = arith.addf %22, %23 : vector<128x512xf32>
    %25 = math.tanh %24 : vector<128x512xf32>
    %cst_8 = arith.constant 5.000000e-01 : f32
    %26 = vector.broadcast %cst_8 : f32 to vector<128x512xf32>
    %27 = arith.mulf %26, %25 : vector<128x512xf32>
    %cst_9 = arith.constant 5.000000e-01 : f32
    %28 = vector.broadcast %cst_9 : f32 to vector<128x512xf32>
    %29 = arith.addf %27, %28 : vector<128x512xf32>
    %c0_10 = arith.constant 0 : index
    %c1_11 = arith.constant 1 : index
    %c0_12 = arith.constant 0 : index
    %c0_13 = arith.constant 0 : index
    %30 = vector.load %arg4[%c0_10, %c1_11, %c0_12, %c0_13] : memref<1x3x128x512xf32, #tpu.memory_space<vmem>>, vector<1x1x128x512xf32>
    %31 = vector.shape_cast %30 : vector<1x1x128x512xf32> to vector<128x512xf32>
    %32 = vector.shape_cast %29 : vector<128x512xf32> to vector<1x1x128x512xf32>
    tpu.vector_store %arg4[%c0_10, %c1_11, %c0_12, %c0_13], %32 {strides = array<i32>} : memref<1x3x128x512xf32, #tpu.memory_space<vmem>>, vector<1x1x128x512xf32>,
    %33 = vector.broadcast %4 : f32 to vector<128x512xf32>
    %34 = arith.mulf %33, %8 : vector<128x512xf32>
    %35 = vector.broadcast %5 : f32 to vector<128x512xf32>
    %36 = arith.addf %34, %35 : vector<128x512xf32>
    %37 = math.tanh %36 : vector<128x512xf32>
    %cst_14 = arith.constant 5.000000e-01 : f32
    %38 = vector.broadcast %cst_14 : f32 to vector<128x512xf32>
    %39 = arith.mulf %38, %37 : vector<128x512xf32>
    %cst_15 = arith.constant 5.000000e-01 : f32
    %40 = vector.broadcast %cst_15 : f32 to vector<128x512xf32>
    %41 = arith.addf %39, %40 : vector<128x512xf32>
    %c0_16 = arith.constant 0 : index
    %c2_17 = arith.constant 2 : index
    %c0_18 = arith.constant 0 : index
    %c0_19 = arith.constant 0 : index
    %42 = vector.load %arg4[%c0_16, %c2_17, %c0_18, %c0_19] : memref<1x3x128x512xf32, #tpu.memory_space<vmem>>, vector<1x1x128x512xf32>
    %43 = vector.shape_cast %42 : vector<1x1x128x512xf32> to vector<128x512xf32>
    %44 = vector.shape_cast %41 : vector<128x512xf32> to vector<1x1x128x512xf32>
    tpu.vector_store %arg4[%c0_16, %c2_17, %c0_18, %c0_19], %44 {strides = array<i32>} : memref<1x3x128x512xf32, #tpu.memory_space<vmem>>, vector<1x1x128x512xf32>,
    return
  }
  func.func @transform_0(%arg0: i32, %arg1: i32) -> i32 {
    %c0_i32 = arith.constant 0 : i32
    %c0_i32_0 = arith.constant 0 : i32
    return %c0_i32 : i32
  }
  func.func @transform_1(%arg0: i32, %arg1: i32) -> (i32, i32, i32) {
    %c0_i32 = arith.constant 0 : i32
    %c0_i32_0 = arith.constant 0 : i32
    return %arg0, %arg1, %c0_i32 : i32, i32, i32
  }
  func.func @transform_2(%arg0: i32, %arg1: i32) -> (i32, i32, i32, i32) {
    %c0_i32 = arith.constant 0 : i32
    %c0_i32_0 = arith.constant 0 : i32
    %c0_i32_1 = arith.constant 0 : i32
    return %arg0, %c0_i32, %arg1, %c0_i32_0 : i32, i32, i32, i32
  }
}

</mosaic_0001>

<bundles_post_ra>
// kernel: tpu_custom_call.1
= control target key start
LH: loop header
LB: loop body
LE: loop exit
PB: predicated region body
PF: predicated region fallthrough
CT: control target
= control target key end

     0   :  { %s3591_s0 = inlined_call_operand.hbm [shape: f32[6], index: 0, kind: input, shape index: {}]   ;;  %s3592_s1 = inlined_call_operand.hbm [shape: s16[2,512,512], index: 1, kind: input, shape index: {}]   ;;  %s3593_s2 = inlined_call_operand.hbm [shape: f32[2,3,512,512], index: 2, kind: output, shape index: {}]  }
   0x1   :  { %3644 = sst [smem:[#allocation42_spill]] %s3591_s0 }
   0x2   :  { %7 = vsyncpa [#allocation5], 0 }
   0x3   :  { %8 = vsyncpa [#allocation3], 0 }
   0x4   :  { %10 = vsyncpa [#allocation3 + $0x1], 0 }
   0x5   :  { %11 = vsyncpa [#allocation4], 0 }
   0x6   :  { %13 = vsyncpa [#allocation4 + $0x1], 0  ;;  %s2447_s9 = smov 0   ;;  %s2449_s10 = smov 0  }
   0x7   :  { %s2451_s11 = smov 0   ;;  %s2453_s12 = smov 0  }
   0x8   :  { %s2455_s13 = smov 0   ;;  %s2457_s14 = smov 0  }
   0x9   :  { %s2459_s15 = smov 0   ;;  %s2461_s16 = smov 0  }
   0xa LB: > { %3645 = sst [smem:[#allocation13_spill]] %s2391_s9  ;;  %s1663_s17 = sadd.s32 4294967295, %s2419_s16   ;;  %s2419_s16 = sphi %s2461_s16, %s19_s16   ;;  %s2415_s15 = sphi %s2459_s15, %s3733_s15   ;;  %s2411_s14 = sphi %s2457_s14, %s3728_s14   ;;  %s2407_s13 = sphi %s2455_s13, %s3732_s13   ;;  %s2403_s12 = sphi %s2453_s12, %s3727_s12   ;;  %s2399_s11 = sphi %s2451_s11, %s3731_s11   ;;  %s2395_s10 = sphi %s2449_s10, %s3730_s10   ;;  %s2391_s9 = sphi %s2447_s9, %s3729_s9  }
   0xb   : > { %3646 = sst [smem:[#allocation14_spill]] %s2411_s14  ;;  %s1664_s18 = sadd.s32 4294967294, %s2419_s16  }
   0xc   : > { %3647 = sst [smem:[#allocation15_spill]] %s2419_s16  ;;  %p68_p0 = scmp.ne.s32.totalorder %s2399_s11, %s2395_s10 }
   0xd   : > { %p69_p1 = scmp.eq.s32.totalorder %s2419_s16, 0  ;;  %p74_p2 = scmp.ne.s32.totalorder %s2395_s10, %s2391_s9 }
   0xe   : > { %p2495_p3 = scmp.eq.s32.totalorder %s1663_s17, 0  ;;  %p100_p4 = scmp.eq.s32.totalorder %s1663_s17, 7 }
   0xf   : > { %p70_p5 = por %p69_p1, %p68_p0  ;;  %p106_p6 = scmp.eq.s32.totalorder %s1664_s18, 7 }
  0x10   : > { %p2501_p7 = por %p2495_p3, %p74_p2  ;;  %p2505_p8 = por %p100_p4, %p68_p0 }
  0x11   : > { %p2509_p9 = por %p106_p6, %p74_p2  ;;  %p1665_p10 = scmp.ge.s32.totalorder %s2419_s16, 1 }
  0x12   : > { %p113_p11 = scmp.lt.s32.totalorder %s2419_s16, 9  ;;  %p1845_p13 = scmp.lt.s32.totalorder %s2419_s16, 8 }
  0x13   : > { %s3651_s23 = scalar_select %p2509_p9, 1, 0 }
  0x14   : > { %p2515_p12 = pnand %p1665_p10, %p113_p11  ;;  %p2522_p1 = pnand %p1845_p13, %p70_p5 }
  0x15   : > { %3652 = sst [smem:[#allocation16_spill]] %s3651_s23  ;;  %s28_s26 = sadd.s32 1, %s2411_s14 }
  0x16   : > { %p1832_p0 = pneg %p2515_p12  ;;  %s31_s27 = sadd.s32 1, %s2415_s15 }
  0x17   : > { %p29_p4 = scmp.ge.s32.totalorder %s28_s26, 4  ;;  %s2421_s28 = smov [#allocation2]  }
  0x18   : > { %p1833_p2 = pnand %p1832_p0, %p2495_p3  ;;  %s3655_s0 = sld [smem:[#allocation42_spill]] }
  0x19   : > { %s3735_s26 = smov (%p29_p4, %s28_s26), 0  ;;  %s3737_s27 = smov (!%p29_p4, %s31_s27), %s2415_s15 }
  0x1a   : > { %3656 = sst [smem:[#allocation17_spill]] %s3735_s26  ;;  %s57_s3 = ssub.s32 %s2411_s14, %s3735_s26 }
  0x1b   : > { %s135_s4 = sand.u32 1, %s2399_s11   ;;  %p33_p5 = scmp.ge.s32.totalorder %s3737_s27, 2 }
  0x1c   : > { %s1668_s5 = sshll.u32 %s135_s4, 8  ;;  %s1814_s6 = sshll.u32 %s2411_s14, 6 }
  0x1d   : > { %s3739_s27 = smov (%p33_p5, %s3737_s27), 0  ;;  %s1671_s7 = sshll.u32 %s2415_s15, 8 }
  0x1e   : > { %1835 = dma.hbm_to_smem (!%p1833_p2), %s3655_s0, 16, %s2421_s28, [#allocation5]  }
  0x1f   : > { %s56_s8 = ssub.s32 %s2415_s15, %s3739_s27  ;;  %s146_s17 = sadd.s32 %s1814_s6, %s1671_s7 }
  0x20   : > { %s58_s18 = sor.u32 %s57_s3, %s56_s8  ;;  %s1672_s28 = sshll.u32 %s146_s17, 6 }
  0x21   : > { %p59_p6 = scmp.eq.s32.totalorder %s58_s18, 0  ;;  %s148_s19 = scalar_lea.hbm %s3592_s1, %s1672_s28 }
  0x22   : > { %s139_s0 = scalar_lea.vmem [#allocation6], %s1668_s5  ;;  %s3657_s23 = sadd.s32 1, %s2399_s11 }
  0x23   : > { %s149_s26 = sshll.u32 %s139_s0, 4  ;;  %s136_s14 = scalar_lea.sflag [#allocation3], %s135_s4  ;;  %s150_s26 = int_to_ptr.vmem [resolvable:$true] %s149_s26 }
  0x24   : > { %s2551_s9 = scalar_select %p59_p6, %s2399_s11, %s3657_s23  }
  0x25   : > { %p2319_p10 = pneg %p2522_p1  ;;  %s2330_s16 = scalar_lea.vmem %s150_s26, 4096 }
  0x26   : > { %p2331_p11 = scmp.ne.s32.totalorder %s150_s26, %s2330_s16  ;;  %s2422_s3 = smov [#allocation6]  }
  0x27   : > { %s2335_s6 = sshll.u32 %s2422_s3, 4  ;;  %s2336_s6 = int_to_ptr.vmem [resolvable:$false] %s2335_s6 }
  0x28   : > { %p2333_p13 = pnand %p2331_p11, %p2319_p10  ;;  %s2337_s7 = scalar_lea.vmem %s2336_s6, 8192 }
  0x29   : > { %p2338_p2 = scmp.lt.s32.totalorder %s150_s26, %s2336_s6  ;;  %p2339_p4 = scmp.lt.s32.totalorder %s2337_s7, %s2330_s16 }
  0x2a   : > { %p2334_p0 = pneg %p2333_p13 }
  0x2b   : > { %p2340_p5 = por %p2339_p4, %p2338_p2 }
  0x2d   : > { %p2341_p9 = pnand %p2340_p5, %p2334_p0 }
  0x2f   : > { %2344 = shalt.err (!%p2341_p9)
}
  0x30   : > { %s2423_s0 = smov 256   ;;  %s2424_s23 = smov 16  }
  0x31   : > { %1839 = dma.hbm_to_vmem [thread:$0]  (!%p2522_p1), %s148_s19, 4096, %s150_s26, %s136_s14, %s2423_s0, %s2423_s0, %s2424_s23  }
  0x32   : > { %161 = sbr.rel (%p2515_p12) target bundleno = 361 (0x169), region = 28 }
  0x37   : > { %2378 = dma.done.wait (%p2495_p3), [#allocation5], 16  }
  0x38   : > { %2380 = vsyncadd (%p2495_p3), [#allocation5], 4294967280  ;;  %s2564_s16 = sand.u32 1, %s2395_s10  }
  0x39   : > { %s1675_s4 = sshll.u32 %s2564_s16, 8  ;;  %s168_s5 = scalar_lea.sflag [#allocation3], %s2564_s16 }
  0x3a   : > { %s2568_s8 = scalar_lea.vmem [#allocation6], %s1675_s4 }
  0x3b   : > { %2382 = dma.done.wait (%p2501_p7), %s168_s5, 4096  }
  0x3c   : > { %2384 = vsyncadd (%p2501_p7), %s168_s5, 4294963200 }
  0x3d   : > { %176 = sfence }
  0x3e   : > { %s195_s14 = sld [smem:[#allocation2]]  ;;  %v201_v0 = vld [vmem:[%s2568_s8] sm:$0xff]  ;;  %v202_v1 = vld [vmem:[%s2568_s8 + $0x8] sm:$0xff]  ;;  %v203_v2 = vld [vmem:[%s2568_s8 + $0x10] sm:$0xff]  ;;  %s1816_s20 = smul.u32 1536, %s2564_s16 }
  0x3f   : > { %s2577_s19 = sld [smem:[#allocation2 + $0x1]]  ;;  %v233_v3 = vunpack.c.l.b16 %v201_v0  ;;  %v234_v4 = vunpack.c.h.b16 %v201_v0  ;;  %v235_v5 = vunpack.c.l.b16 %v202_v1  ;;  %v236_v6 = vunpack.c.h.b16 %v202_v1  ;;  %v204_v7 = vld [vmem:[%s2568_s8 + $0x18] sm:$0xff]  ;;  %v205_v12 = vld [vmem:[%s2568_s8 + $0x20] sm:$0xff]  ;;  %v206_v13 = vld [vmem:[%s2568_s8 + $0x28] sm:$0xff]  ;;  %s1522_s18 = scalar_lea.sflag [#allocation4], %s2564_s16 }
  0x40   : > { %v237_v8 = vunpack.c.l.b16 %v203_v2  ;;  %v238_v9 = vunpack.c.h.b16 %v203_v2  ;;  %v239_v10 = vunpack.c.l.b16 %v204_v7  ;;  %v240_v11 = vunpack.c.h.b16 %v204_v7  ;;  %v207_v18 = vld [vmem:[%s2568_s8 + $0x30] sm:$0xff]  ;;  %v2592_v19 = vld [vmem:[%s2568_s8 + $0x38] sm:$0xff]  ;;  %v209_v63 = vld [vmem:[%s2568_s8 + $0x40] sm:$0xff]  ;;  %s2709_s21 = scalar_lea.vmem [#allocation7], %s1816_s20  ;;  %s2961_s24 = sld [smem:[#allocation2 + $0x2]] }
  0x41   : > { %v2582_v14 = vcvt.s32.f32 %v233_v3  ;;  %v2584_v15 = vcvt.s32.f32 %v234_v4  ;;  %v2586_v16 = vcvt.s32.f32 %v235_v5  ;;  %v2588_v17 = vcvt.s32.f32 %v236_v6  ;;  %v210_v0 = vld [vmem:[%s2568_s8 + $0x48] sm:$0xff]  ;;  %s2968_s25 = sld [smem:[#allocation2 + $0x3]] }
  0x42   : > { %v2594_v20 = vcvt.s32.f32 %v237_v8  ;;  %v2596_v21 = vcvt.s32.f32 %v238_v9  ;;  %v2598_v22 = vcvt.s32.f32 %v239_v10  ;;  %v2600_v23 = vcvt.s32.f32 %v240_v11  ;;  %s3233_s26 = sld [smem:[#allocation2 + $0x4]] }
  0x43   : > { %3658 = vst [vmem:[#allocation18_spill] sm:$0xff] %v2582_v14  ;;  %3659 = vst [vmem:[#allocation19_spill] sm:$0xff] %v2584_v15  ;;  %v241_v24 = vunpack.c.l.b16 %v205_v12  ;;  %v242_v25 = vunpack.c.h.b16 %v205_v12  ;;  %v243_v26 = vunpack.c.l.b16 %v206_v13  ;;  %v244_v27 = vunpack.c.h.b16 %v206_v13  ;;  %s3237_s17 = sld [smem:[#allocation2 + $0x5]] }
  0x44   : > { %v2602_v28 = vstv %s195_s14  ;;  %v245_v29 = vunpack.c.l.b16 %v207_v18  ;;  %v246_v30 = vunpack.c.h.b16 %v207_v18  ;;  %v247_v31 = vunpack.c.l.b16 %v2592_v19 }
  0x45   : > { %v362_v32 = vmul.f32 %v2602_v28, %v2582_v14  ;;  %v2608_v33 = vstv %s2577_s19  ;;  %v363_v34 = vmul.f32 %v2602_v28, %v2584_v15  ;;  %v364_v35 = vmul.f32 %v2602_v28, %v2586_v16 }
  0x46   : > { %v365_v36 = vmul.f32 %v2602_v28, %v2588_v17  ;;  %v366_v37 = vmul.f32 %v2602_v28, %v2594_v20  ;;  %v367_v38 = vmul.f32 %v2602_v28, %v2596_v21  ;;  %v368_v39 = vmul.f32 %v2602_v28, %v2598_v22 }
  0x47   : > { %v427_v40 = vadd.f32 %v2608_v33, %v362_v32  ;;  %v428_v41 = vadd.f32 %v2608_v33, %v363_v34  ;;  %v429_v42 = vadd.f32 %v2608_v33, %v364_v35  ;;  %v369_v43 = vmul.f32 %v2602_v28, %v2600_v23 }
  0x48   : > { %v430_v44 = vadd.f32 %v2608_v33, %v365_v36  ;;  %v431_v45 = vadd.f32 %v2608_v33, %v366_v37  ;;  %v432_v46 = vadd.f32 %v2608_v33, %v367_v38  ;;  %v433_v47 = vadd.f32 %v2608_v33, %v368_v39  ;;  %v2694_v36 = vld [vmem:[%s2568_s8 + $0x58] sm:$0xff] }
  0x49   : > { %1922 = vtanh.f32 %v427_v40  ;;  %v434_v48 = vadd.f32 %v2608_v33, %v369_v43  ;;  %v2632_v49 = vcvt.s32.f32 %v241_v24  ;;  %v2634_v50 = vcvt.s32.f32 %v242_v25 }
  0x4a   : > { %1924 = vtanh.f32 %v428_v41  ;;  %v2636_v51 = vcvt.s32.f32 %v243_v26  ;;  %v2638_v52 = vcvt.s32.f32 %v244_v27  ;;  %v2640_v53 = vcvt.s32.f32 %v245_v29 }
  0x4b   : > { %1926 = vtanh.f32 %v429_v42  ;;  %v370_v54 = vmul.f32 %v2602_v28, %v2632_v49  ;;  %v371_v55 = vmul.f32 %v2602_v28, %v2634_v50  ;;  %v2646_v56 = vcvt.s32.f32 %v246_v30 }
  0x4c   : > { %1928 = vtanh.f32 %v430_v44  ;;  %v372_v57 = vmul.f32 %v2602_v28, %v2636_v51  ;;  %v373_v58 = vmul.f32 %v2602_v28, %v2638_v52  ;;  %v374_v59 = vmul.f32 %v2602_v28, %v2640_v53 }
  0x4d   : > { %1930 = vtanh.f32 %v431_v45  ;;  %v435_v60 = vadd.f32 %v2608_v33, %v370_v54  ;;  %v436_v61 = vadd.f32 %v2608_v33, %v371_v55  ;;  %v375_v62 = vmul.f32 %v2602_v28, %v2646_v56 }
  0x4e   : > { %1932 = vtanh.f32 %v432_v46  ;;  %v437_v1 = vadd.f32 %v2608_v33, %v372_v57  ;;  %v438_v2 = vadd.f32 %v2608_v33, %v373_v58  ;;  %v439_v3 = vadd.f32 %v2608_v33, %v374_v59 }
  0x4f   : > { %1934 = vtanh.f32 %v433_v47  ;;  %v440_v4 = vadd.f32 %v2608_v33, %v375_v62  ;;  %v2664_v5 = vcvt.s32.f32 %v247_v31  ;;  %v248_v6 = vunpack.c.h.b16 %v2592_v19  ;;  %v211_v19 = vld [vmem:[%s2568_s8 + $0x50] sm:$0xff] }
  0x50   : > { %1936 = vtanh.f32 %v434_v48  ;;  %v249_v7 = vunpack.c.l.b16 %v209_v63  ;;  %v250_v8 = vunpack.c.h.b16 %v209_v63  ;;  %v251_v9 = vunpack.c.l.b16 %v210_v0 }
  0x51   : > { %1938 = vtanh.f32 %v435_v60  ;;  %v376_v10 = vmul.f32 %v2602_v28, %v2664_v5  ;;  %v2669_v11 = vcvt.s32.f32 %v248_v6  ;;  %v252_v12 = vunpack.c.h.b16 %v210_v0 }
  0x52   : > { %1940 = vtanh.f32 %v436_v61  ;;  %v2671_v13 = vcvt.s32.f32 %v249_v7  ;;  %v2673_v18 = vcvt.s32.f32 %v250_v8  ;;  %v2675_v24 = vcvt.s32.f32 %v251_v9  ;;  %v213_v8 = vld [vmem:[%s2568_s8 + $0x60] sm:$0xff] }
  0x53   : > { %1942 = vtanh.f32 %v437_v1  ;;  %v441_v25 = vadd.f32 %v2608_v33, %v376_v10  ;;  %v377_v26 = vmul.f32 %v2602_v28, %v2669_v11  ;;  %v2681_v27 = vcvt.s32.f32 %v252_v12 }
  0x54   : > { %1944 = vtanh.f32 %v438_v2  ;;  %v378_v29 = vmul.f32 %v2602_v28, %v2671_v13  ;;  %v379_v30 = vmul.f32 %v2602_v28, %v2673_v18  ;;  %v380_v31 = vmul.f32 %v2602_v28, %v2675_v24 }
  0x55   : > { %1946 = vtanh.f32 %v439_v3  ;;  %v442_v32 = vadd.f32 %v2608_v33, %v377_v26  ;;  %v381_v34 = vmul.f32 %v2602_v28, %v2681_v27  ;;  %v253_v35 = vunpack.c.l.b16 %v211_v19 }
  0x56   : > { %v1923_v37 = vpop.eup %1922  ;;  %1948 = vtanh.f32 %v440_v4  ;;  %v443_v38 = vadd.f32 %v2608_v33, %v378_v29  ;;  %v444_v39 = vadd.f32 %v2608_v33, %v379_v30  ;;  %v445_v40 = vadd.f32 %v2608_v33, %v380_v31 }
  0x57   : > { %v1925_v41 = vpop.eup %1924  ;;  %v555_v42 = vmul.f32 0.5, %v1923_v37  ;;  %1950 = vtanh.f32 %v441_v25  ;;  %v446_v43 = vadd.f32 %v2608_v33, %v381_v34  ;;  %v2700_v44 = vcvt.s32.f32 %v253_v35 }
  0x58   : > { %v1927_v45 = vpop.eup %1926  ;;  %v556_v46 = vmul.f32 0.5, %v1925_v41  ;;  %1952 = vtanh.f32 %v442_v32  ;;  %v254_v47 = vunpack.c.h.b16 %v211_v19  ;;  %v255_v48 = vunpack.c.l.b16 %v2694_v36 }
  0x59   : > { %v1929_v54 = vpop.eup %1928  ;;  %v619_v55 = vadd.f32 0.5, %v555_v42  ;;  %v557_v57 = vmul.f32 0.5, %v1927_v45  ;;  %1954 = vtanh.f32 %v443_v38  ;;  %v382_v58 = vmul.f32 %v2602_v28, %v2700_v44 }
  0x5a   : > { %v1931_v59 = vpop.eup %1930  ;;  %v620_v60 = vadd.f32 0.5, %v556_v46  ;;  %v558_v61 = vmul.f32 0.5, %v1929_v54  ;;  %1956 = vtanh.f32 %v444_v39  ;;  %v2705_v62 = vcvt.s32.f32 %v254_v47 }
  0x5b   : > { %v1933_v63 = vpop.eup %1932  ;;  %683 = vst [vmem:[%s2709_s21] sm:$0xff] %v619_v55  ;;  %v621_v0 = vadd.f32 0.5, %v557_v57  ;;  %v559_v1 = vmul.f32 0.5, %v1931_v59  ;;  %1958 = vtanh.f32 %v445_v40  ;;  %v447_v2 = vadd.f32 %v2608_v33, %v382_v58  ;;  %v214_v59 = vld [vmem:[%s2568_s8 + $0x68] sm:$0xff] }
  0x5c   : > { %v1935_v3 = vpop.eup %1934  ;;  %684 = vst [vmem:[%s2709_s21 + $0x8] sm:$0xff] %v620_v60  ;;  %v622_v4 = vadd.f32 0.5, %v558_v61  ;;  %v560_v6 = vmul.f32 0.5, %v1933_v63  ;;  %1960 = vtanh.f32 %v446_v43  ;;  %v383_v7 = vmul.f32 %v2602_v28, %v2705_v62 }
  0x5d   : > { %v1937_v9 = vpop.eup %1936  ;;  %685 = vst [vmem:[%s2709_s21 + $0x10] sm:$0xff] %v621_v0  ;;  %v623_v10 = vadd.f32 0.5, %v559_v1  ;;  %v561_v12 = vmul.f32 0.5, %v1935_v3  ;;  %1962 = vtanh.f32 %v447_v2  ;;  %v2718_v19 = vcvt.s32.f32 %v255_v48 }
  0x5e   : > { %v1939_v25 = vpop.eup %1938  ;;  %686 = vst [vmem:[%s2709_s21 + $0x18] sm:$0xff] %v622_v4  ;;  %v624_v26 = vadd.f32 0.5, %v560_v6  ;;  %v562_v29 = vmul.f32 0.5, %v1937_v9  ;;  %v448_v30 = vadd.f32 %v2608_v33, %v383_v7  ;;  %v256_v31 = vunpack.c.h.b16 %v2694_v36 }
  0x5f   : > { %v1941_v32 = vpop.eup %1940  ;;  %687 = vst [vmem:[%s2709_s21 + $0x20] sm:$0xff] %v623_v10  ;;  %v625_v34 = vadd.f32 0.5, %v561_v12  ;;  %v563_v35 = vmul.f32 0.5, %v1939_v25  ;;  %v384_v37 = vmul.f32 %v2602_v28, %v2718_v19  ;;  %v257_v38 = vunpack.c.l.b16 %v213_v8 }
  0x60   : > { %v1943_v39 = vpop.eup %1942  ;;  %688 = vst [vmem:[%s2709_s21 + $0x28] sm:$0xff] %v624_v26  ;;  %v626_v40 = vadd.f32 0.5, %v562_v29  ;;  %v564_v41 = vmul.f32 0.5, %v1941_v32  ;;  %1964 = vtanh.f32 %v448_v30  ;;  %v2727_v42 = vcvt.s32.f32 %v256_v31  ;;  %v215_v31 = vld [vmem:[%s2568_s8 + $0x70] sm:$0xff] }
  0x61   : > { %v1945_v43 = vpop.eup %1944  ;;  %689 = vst [vmem:[%s2709_s21 + $0x30] sm:$0xff] %v625_v34  ;;  %v627_v36 = vadd.f32 0.5, %v563_v35  ;;  %v565_v45 = vmul.f32 0.5, %v1943_v39  ;;  %v449_v46 = vadd.f32 %v2608_v33, %v384_v37  ;;  %v2731_v47 = vcvt.s32.f32 %v257_v38 }
  0x62   : > { %v1947_v48 = vpop.eup %1946  ;;  %690 = vst [vmem:[%s2709_s21 + $0x38] sm:$0xff] %v626_v40  ;;  %v628_v54 = vadd.f32 0.5, %v564_v41  ;;  %v566_v55 = vmul.f32 0.5, %v1945_v43  ;;  %v385_v57 = vmul.f32 %v2602_v28, %v2727_v42  ;;  %v258_v58 = vunpack.c.h.b16 %v213_v8 }
  0x63   : > { %v1949_v60 = vpop.eup %1948  ;;  %691 = vst [vmem:[%s2709_s21 + $0x40] sm:$0xff] %v627_v36  ;;  %v629_v61 = vadd.f32 0.5, %v565_v45  ;;  %v567_v63 = vmul.f32 0.5, %v1947_v48  ;;  %1966 = vtanh.f32 %v449_v46  ;;  %v386_v0 = vmul.f32 %v2602_v28, %v2731_v47 }
  0x64   : > { %v1951_v1 = vpop.eup %1950  ;;  %692 = vst [vmem:[%s2709_s21 + $0x48] sm:$0xff] %v628_v54  ;;  %v630_v2 = vadd.f32 0.5, %v566_v55  ;;  %v568_v3 = vmul.f32 0.5, %v1949_v60  ;;  %v450_v4 = vadd.f32 %v2608_v33, %v385_v57  ;;  %v2742_v6 = vcvt.s32.f32 %v258_v58  ;;  %v216_v55 = vld [vmem:[%s2568_s8 + $0x78] sm:$0xff] }
  0x65   : > { %v1953_v7 = vpop.eup %1952  ;;  %693 = vst [vmem:[%s2709_s21 + $0x50] sm:$0xff] %v629_v61  ;;  %v631_v8 = vadd.f32 0.5, %v567_v63  ;;  %v569_v9 = vmul.f32 0.5, %v1951_v1  ;;  %v451_v10 = vadd.f32 %v2608_v33, %v386_v0  ;;  %v259_v12 = vunpack.c.l.b16 %v214_v59 }
  0x66   : > { %v1955_v25 = vpop.eup %1954  ;;  %694 = vst [vmem:[%s2709_s21 + $0x58] sm:$0xff] %v630_v2  ;;  %v632_v26 = vadd.f32 0.5, %v568_v3  ;;  %v570_v29 = vmul.f32 0.5, %v1953_v7  ;;  %1968 = vtanh.f32 %v450_v4  ;;  %v387_v30 = vmul.f32 %v2602_v28, %v2742_v6 }
  0x67   : > { %v1957_v32 = vpop.eup %1956  ;;  %695 = vst [vmem:[%s2709_s21 + $0x60] sm:$0xff] %v631_v8  ;;  %v633_v34 = vadd.f32 0.5, %v569_v9  ;;  %v571_v35 = vmul.f32 0.5, %v1955_v25  ;;  %1970 = vtanh.f32 %v451_v10  ;;  %v2751_v37 = vcvt.s32.f32 %v259_v12  ;;  %v217_v8 = vld [vmem:[%s2568_s8 + $0x80] sm:$0xff] }
  0x68   : > { %v1959_v38 = vpop.eup %1958  ;;  %696 = vst [vmem:[%s2709_s21 + $0x68] sm:$0xff] %v632_v26  ;;  %v634_v39 = vadd.f32 0.5, %v570_v29  ;;  %v572_v40 = vmul.f32 0.5, %v1957_v32  ;;  %v452_v41 = vadd.f32 %v2608_v33, %v387_v30  ;;  %v260_v43 = vunpack.c.h.b16 %v214_v59 }
  0x69   : > { %v1961_v36 = vpop.eup %1960  ;;  %697 = vst [vmem:[%s2709_s21 + $0x70] sm:$0xff] %v633_v34  ;;  %v635_v45 = vadd.f32 0.5, %v571_v35  ;;  %v573_v46 = vmul.f32 0.5, %v1959_v38  ;;  %v388_v48 = vmul.f32 %v2602_v28, %v2751_v37  ;;  %v261_v54 = vunpack.c.l.b16 %v215_v31 }
  0x6a   : > { %v1963_v57 = vpop.eup %1962  ;;  %698 = vst [vmem:[%s2709_s21 + $0x78] sm:$0xff] %v634_v39  ;;  %v636_v58 = vadd.f32 0.5, %v572_v40  ;;  %v574_v60 = vmul.f32 0.5, %v1961_v36  ;;  %1972 = vtanh.f32 %v452_v41  ;;  %v2760_v61 = vcvt.s32.f32 %v260_v43  ;;  %v218_v39 = vld [vmem:[%s2568_s8 + $0x88] sm:$0xff] }
  0x6b   : > { %699 = vst [vmem:[%s2709_s21 + $0x80] sm:$0xff] %v635_v45  ;;  %v637_v59 = vadd.f32 0.5, %v573_v46  ;;  %v575_v63 = vmul.f32 0.5, %v1963_v57  ;;  %v453_v0 = vadd.f32 %v2608_v33, %v388_v48  ;;  %v2764_v1 = vcvt.s32.f32 %v261_v54 }
  0x6c   : > { %700 = vst [vmem:[%s2709_s21 + $0x88] sm:$0xff] %v636_v58  ;;  %v638_v2 = vadd.f32 0.5, %v574_v60  ;;  %v389_v3 = vmul.f32 %v2602_v28, %v2760_v61  ;;  %v262_v4 = vunpack.c.h.b16 %v215_v31  ;;  %v263_v7 = vunpack.c.l.b16 %v216_v55 }
  0x6d   : > { %v1965_v9 = vpop.eup %1964  ;;  %701 = vst [vmem:[%s2709_s21 + $0x90] sm:$0xff] %v637_v59  ;;  %v639_v10 = vadd.f32 0.5, %v575_v63  ;;  %1974 = vtanh.f32 %v453_v0  ;;  %v390_v12 = vmul.f32 %v2602_v28, %v2764_v1  ;;  %v264_v25 = vunpack.c.h.b16 %v216_v55 }
  0x6e   : > { %702 = vst [vmem:[%s2709_s21 + $0x98] sm:$0xff] %v638_v2  ;;  %v576_v26 = vmul.f32 0.5, %v1965_v9  ;;  %v454_v29 = vadd.f32 %v2608_v33, %v389_v3  ;;  %v2775_v30 = vcvt.s32.f32 %v262_v4  ;;  %v2777_v32 = vcvt.s32.f32 %v263_v7  ;;  %v219_v9 = vld [vmem:[%s2568_s8 + $0x90] sm:$0xff] }
  0x6f   : > { %703 = vst [vmem:[%s2709_s21 + $0xa0] sm:$0xff] %v639_v10  ;;  %v455_v31 = vadd.f32 %v2608_v33, %v390_v12  ;;  %v2781_v34 = vcvt.s32.f32 %v264_v25  ;;  %v265_v35 = vunpack.c.l.b16 %v217_v8  ;;  %v266_v38 = vunpack.c.h.b16 %v217_v8 }
  0x70   : > { %v1967_v40 = vpop.eup %1966  ;;  %v640_v41 = vadd.f32 0.5, %v576_v26  ;;  %1976 = vtanh.f32 %v454_v29  ;;  %v391_v43 = vmul.f32 %v2602_v28, %v2775_v30  ;;  %v392_v36 = vmul.f32 %v2602_v28, %v2777_v32 }
  0x71   : > { %v577_v45 = vmul.f32 0.5, %v1967_v40  ;;  %1978 = vtanh.f32 %v455_v31  ;;  %v393_v46 = vmul.f32 %v2602_v28, %v2781_v34  ;;  %v2790_v48 = vcvt.s32.f32 %v265_v35  ;;  %v220_v35 = vld [vmem:[%s2568_s8 + $0x98] sm:$0xff] }
  0x72   : > { %704 = vst [vmem:[%s2709_s21 + $0xa8] sm:$0xff] %v640_v41  ;;  %v456_v54 = vadd.f32 %v2608_v33, %v391_v43  ;;  %v457_v55 = vadd.f32 %v2608_v33, %v392_v36  ;;  %v2795_v57 = vcvt.s32.f32 %v266_v38  ;;  %v267_v58 = vunpack.c.l.b16 %v218_v39  ;;  %v221_v43 = vld [vmem:[%s2568_s8 + $0xa0] sm:$0xff] }
  0x73   : > { %v1969_v60 = vpop.eup %1968  ;;  %v641_v59 = vadd.f32 0.5, %v577_v45  ;;  %v458_v63 = vadd.f32 %v2608_v33, %v393_v46  ;;  %v394_v0 = vmul.f32 %v2602_v28, %v2790_v48  ;;  %v268_v2 = vunpack.c.h.b16 %v218_v39 }
  0x74   : > { %v1971_v3 = vpop.eup %1970  ;;  %v578_v4 = vmul.f32 0.5, %v1969_v60  ;;  %1980 = vtanh.f32 %v456_v54  ;;  %v395_v7 = vmul.f32 %v2602_v28, %v2795_v57  ;;  %v2802_v8 = vcvt.s32.f32 %v267_v58 }
  0x75   : > { %705 = vst [vmem:[%s2709_s21 + $0xb0] sm:$0xff] %v641_v59  ;;  %v579_v10 = vmul.f32 0.5, %v1971_v3  ;;  %1982 = vtanh.f32 %v457_v55  ;;  %v459_v12 = vadd.f32 %v2608_v33, %v394_v0  ;;  %v2807_v25 = vcvt.s32.f32 %v268_v2  ;;  %v222_v3 = vld [vmem:[%s2568_s8 + $0xa8] sm:$0xff] }
  0x76   : > { %v642_v26 = vadd.f32 0.5, %v578_v4  ;;  %1984 = vtanh.f32 %v458_v63  ;;  %v460_v29 = vadd.f32 %v2608_v33, %v395_v7  ;;  %v396_v31 = vmul.f32 %v2602_v28, %v2802_v8 }
  0x77   : > { %v1973_v38 = vpop.eup %1972  ;;  %v643_v39 = vadd.f32 0.5, %v579_v10  ;;  %1986 = vtanh.f32 %v459_v12  ;;  %v397_v40 = vmul.f32 %v2602_v28, %v2807_v25  ;;  %v269_v41 = vunpack.c.l.b16 %v219_v9 }
  0x78   : > { %706 = vst [vmem:[%s2709_s21 + $0xb8] sm:$0xff] %v642_v26  ;;  %v580_v36 = vmul.f32 0.5, %v1973_v38  ;;  %1988 = vtanh.f32 %v460_v29  ;;  %v461_v45 = vadd.f32 %v2608_v33, %v396_v31  ;;  %v270_v46 = vunpack.c.h.b16 %v219_v9 }
  0x79   : > { %707 = vst [vmem:[%s2709_s21 + $0xc0] sm:$0xff] %v643_v39  ;;  %v462_v54 = vadd.f32 %v2608_v33, %v397_v40  ;;  %v2820_v55 = vcvt.s32.f32 %v269_v41  ;;  %v271_v58 = vunpack.c.l.b16 %v220_v35  ;;  %v272_v60 = vunpack.c.h.b16 %v220_v35 }
  0x7a   : > { %v1975_v59 = vpop.eup %1974  ;;  %v644_v63 = vadd.f32 0.5, %v580_v36  ;;  %1990 = vtanh.f32 %v461_v45  ;;  %v2822_v0 = vcvt.s32.f32 %v270_v46  ;;  %v273_v2 = vunpack.c.l.b16 %v221_v43 }
  0x7b   : > { %v581_v4 = vmul.f32 0.5, %v1975_v59  ;;  %1992 = vtanh.f32 %v462_v54  ;;  %v398_v7 = vmul.f32 %v2602_v28, %v2820_v55  ;;  %v2827_v9 = vcvt.s32.f32 %v271_v58  ;;  %v223_v59 = vld [vmem:[%s2568_s8 + $0xb0] sm:$0xff] }
  0x7c   : > { %708 = vst [vmem:[%s2709_s21 + $0xc8] sm:$0xff] %v644_v63  ;;  %v399_v10 = vmul.f32 %v2602_v28, %v2822_v0  ;;  %v2832_v12 = vcvt.s32.f32 %v272_v60  ;;  %v2834_v26 = vcvt.s32.f32 %v273_v2  ;;  %v274_v29 = vunpack.c.h.b16 %v221_v43 }
  0x7d   : > { %v1977_v31 = vpop.eup %1976  ;;  %v645_v35 = vadd.f32 0.5, %v581_v4  ;;  %v463_v38 = vadd.f32 %v2608_v33, %v398_v7  ;;  %v400_v39 = vmul.f32 %v2602_v28, %v2827_v9  ;;  %v275_v40 = vunpack.c.l.b16 %v222_v3 }
  0x7e   : > { %3660 = vst [vmem:[#allocation20_spill] sm:$0xff] %v2834_v26  ;;  %v1979_v41 = vpop.eup %1978  ;;  %v582_v36 = vmul.f32 0.5, %v1977_v31  ;;  %v464_v45 = vadd.f32 %v2608_v33, %v399_v10  ;;  %v401_v46 = vmul.f32 %v2602_v28, %v2832_v12  ;;  %v402_v54 = vmul.f32 %v2602_v28, %v2834_v26 }
  0x7f   : > { %709 = vst [vmem:[%s2709_s21 + $0xd0] sm:$0xff] %v645_v35  ;;  %v583_v43 = vmul.f32 0.5, %v1979_v41  ;;  %1994 = vtanh.f32 %v463_v38  ;;  %v465_v58 = vadd.f32 %v2608_v33, %v400_v39  ;;  %v2846_v60 = vcvt.s32.f32 %v274_v29 }
  0x80   : > { %v646_v63 = vadd.f32 0.5, %v582_v36  ;;  %1996 = vtanh.f32 %v464_v45  ;;  %v466_v2 = vadd.f32 %v2608_v33, %v401_v46  ;;  %v467_v4 = vadd.f32 %v2608_v33, %v402_v54 }
  0x81   : > { %3661 = vst [vmem:[#allocation21_spill] sm:$0xff] %v2846_v60  ;;  %v1981_v7 = vpop.eup %1980  ;;  %v647_v10 = vadd.f32 0.5, %v583_v43  ;;  %1998 = vtanh.f32 %v465_v58  ;;  %v403_v31 = vmul.f32 %v2602_v28, %v2846_v60  ;;  %v2853_v35 = vcvt.s32.f32 %v275_v40 }
  0x82   : > { %v1983_v38 = vpop.eup %1982  ;;  %710 = vst [vmem:[%s2709_s21 + $0xd8] sm:$0xff] %v646_v63  ;;  %v584_v29 = vmul.f32 0.5, %v1981_v7  ;;  %2000 = vtanh.f32 %v466_v2  ;;  %v276_v39 = vunpack.c.h.b16 %v222_v3  ;;  %v277_v41 = vunpack.c.l.b16 %v223_v59  ;;  %v224_v3 = vld [vmem:[%s2568_s8 + $0xb8] sm:$0xff] }
  0x83   : > { %3662 = vst [vmem:[#allocation22_spill] sm:$0xff] %v2853_v35  ;;  %v1985_v36 = vpop.eup %1984  ;;  %711 = vst [vmem:[%s2709_s21 + $0xe0] sm:$0xff] %v647_v10  ;;  %v585_v45 = vmul.f32 0.5, %v1983_v38  ;;  %2002 = vtanh.f32 %v467_v4  ;;  %v468_v46 = vadd.f32 %v2608_v33, %v403_v31  ;;  %v404_v54 = vmul.f32 %v2602_v28, %v2853_v35 }
  0x84   : > { %v1987_v43 = vpop.eup %1986  ;;  %v648_v40 = vadd.f32 0.5, %v584_v29  ;;  %v586_v58 = vmul.f32 0.5, %v1985_v36  ;;  %v2860_v63 = vcvt.s32.f32 %v276_v39  ;;  %v2862_v7 = vcvt.s32.f32 %v277_v41 }
  0x85   : > { %v1989_v2 = vpop.eup %1988  ;;  %v649_v10 = vadd.f32 0.5, %v585_v45  ;;  %v587_v60 = vmul.f32 0.5, %v1987_v43  ;;  %2004 = vtanh.f32 %v468_v46  ;;  %v469_v4 = vadd.f32 %v2608_v33, %v404_v54  ;;  %v225_v43 = vld [vmem:[%s2568_s8 + $0xc0] sm:$0xff] }
  0x86   : > { %3663 = vst [vmem:[#allocation23_spill] sm:$0xff] %v2860_v63  ;;  %3664 = vst [vmem:[#allocation24_spill] sm:$0xff] %v2862_v7  ;;  %v650_v31 = vadd.f32 0.5, %v586_v58  ;;  %v588_v38 = vmul.f32 0.5, %v1989_v2  ;;  %v405_v29 = vmul.f32 %v2602_v28, %v2860_v63  ;;  %v406_v39 = vmul.f32 %v2602_v28, %v2862_v7 }
  0x87   : > { %712 = vst [vmem:[%s2709_s21 + $0xe8] sm:$0xff] %v648_v40  ;;  %v1991_v41 = vpop.eup %1990  ;;  %713 = vst [vmem:[%s2709_s21 + $0xf0] sm:$0xff] %v649_v10  ;;  %v651_v36 = vadd.f32 0.5, %v587_v60  ;;  %2006 = vtanh.f32 %v469_v4  ;;  %v278_v45 = vunpack.c.h.b16 %v223_v59  ;;  %v279_v46 = vunpack.c.l.b16 %v224_v3  ;;  %v226_v4 = vld [vmem:[%s2568_s8 + $0xc8] sm:$0xff] }
  0x88   : > { %v1993_v54 = vpop.eup %1992  ;;  %714 = vst [vmem:[%s2709_s21 + $0xf8] sm:$0xff] %v650_v31  ;;  %v652_v40 = vadd.f32 0.5, %v588_v38  ;;  %v589_v58 = vmul.f32 0.5, %v1991_v41  ;;  %v470_v2 = vadd.f32 %v2608_v33, %v405_v29  ;;  %v471_v63 = vadd.f32 %v2608_v33, %v406_v39 }
  0x89   : > { %715 = vst [vmem:[%s2709_s21 + $0x100] sm:$0xff] %v651_v36  ;;  %v590_v7 = vmul.f32 0.5, %v1993_v54  ;;  %v2877_v35 = vcvt.s32.f32 %v278_v45  ;;  %v2879_v60 = vcvt.s32.f32 %v279_v46  ;;  %v280_v10 = vunpack.c.h.b16 %v224_v3 }
  0x8a   : > { %716 = vst [vmem:[%s2709_s21 + $0x108] sm:$0xff] %v652_v40  ;;  %v653_v59 = vadd.f32 0.5, %v589_v58  ;;  %2008 = vtanh.f32 %v470_v2  ;;  %v281_v31 = vunpack.c.l.b16 %v225_v43  ;;  %v282_v38 = vunpack.c.h.b16 %v225_v43 }
  0x8b   : > { %3665 = vst [vmem:[#allocation25_spill] sm:$0xff] %v2877_v35  ;;  %3666 = vst [vmem:[#allocation26_spill] sm:$0xff] %v2879_v60  ;;  %v654_v41 = vadd.f32 0.5, %v590_v7  ;;  %2010 = vtanh.f32 %v471_v63  ;;  %v407_v29 = vmul.f32 %v2602_v28, %v2877_v35  ;;  %v408_v39 = vmul.f32 %v2602_v28, %v2879_v60  ;;  %v227_v35 = vld [vmem:[%s2568_s8 + $0xd0] sm:$0xff] }
  0x8c   : > { %v1995_v36 = vpop.eup %1994  ;;  %717 = vst [vmem:[%s2709_s21 + $0x110] sm:$0xff] %v653_v59  ;;  %v2888_v45 = vcvt.s32.f32 %v280_v10  ;;  %v2890_v3 = vcvt.s32.f32 %v281_v31  ;;  %v2892_v46 = vcvt.s32.f32 %v282_v38  ;;  %v283_v54 = vunpack.c.l.b16 %v226_v4 }
  0x8d   : > { %v1997_v40 = vpop.eup %1996  ;;  %718 = vst [vmem:[%s2709_s21 + $0x118] sm:$0xff] %v654_v41  ;;  %v591_v43 = vmul.f32 0.5, %v1995_v36  ;;  %v472_v63 = vadd.f32 %v2608_v33, %v407_v29  ;;  %v473_v7 = vadd.f32 %v2608_v33, %v408_v39  ;;  %v284_v58 = vunpack.c.h.b16 %v226_v4 }
  0x8e   : > { %3667 = vst [vmem:[#allocation27_spill] sm:$0xff] %v2888_v45  ;;  %3668 = vst [vmem:[#allocation28_spill] sm:$0xff] %v2890_v3  ;;  %v1999_v2 = vpop.eup %1998  ;;  %v592_v60 = vmul.f32 0.5, %v1997_v40  ;;  %v409_v10 = vmul.f32 %v2602_v28, %v2888_v45  ;;  %v410_v59 = vmul.f32 %v2602_v28, %v2890_v3  ;;  %v411_v31 = vmul.f32 %v2602_v28, %v2892_v46 }
  0x8f   : > { %3669 = vst [vmem:[#allocation29_spill] sm:$0xff] %v2892_v46  ;;  %v2001_v38 = vpop.eup %2000  ;;  %v655_v41 = vadd.f32 0.5, %v591_v43  ;;  %v593_v29 = vmul.f32 0.5, %v1999_v2  ;;  %2012 = vtanh.f32 %v472_v63  ;;  %v2903_v39 = vcvt.s32.f32 %v283_v54 }
  0x90   : > { %v2003_v4 = vpop.eup %2002  ;;  %v656_v36 = vadd.f32 0.5, %v592_v60  ;;  %v594_v40 = vmul.f32 0.5, %v2001_v38  ;;  %2014 = vtanh.f32 %v473_v7  ;;  %v474_v45 = vadd.f32 %v2608_v33, %v409_v10  ;;  %v228_v10 = vld [vmem:[%s2568_s8 + $0xd8] sm:$0xff] }
  0x91   : > { %3670 = vst [vmem:[#allocation30_spill] sm:$0xff] %v2903_v39  ;;  %719 = vst [vmem:[%s2709_s21 + $0x120] sm:$0xff] %v655_v41  ;;  %v657_v3 = vadd.f32 0.5, %v593_v29  ;;  %v595_v26 = vmul.f32 0.5, %v2003_v4  ;;  %v475_v43 = vadd.f32 %v2608_v33, %v410_v59  ;;  %v476_v2 = vadd.f32 %v2608_v33, %v411_v31 }
  0x92   : > { %v2005_v63 = vpop.eup %2004  ;;  %720 = vst [vmem:[%s2709_s21 + $0x128] sm:$0xff] %v656_v36  ;;  %v658_v54 = vadd.f32 0.5, %v594_v40  ;;  %2016 = vtanh.f32 %v474_v45  ;;  %v412_v60 = vmul.f32 %v2602_v28, %v2903_v39  ;;  %v2913_v7 = vcvt.s32.f32 %v284_v58  ;;  %v229_v36 = vld [vmem:[%s2568_s8 + $0xe0] sm:$0xff] }
  0x93   : > { %721 = vst [vmem:[%s2709_s21 + $0x130] sm:$0xff] %v657_v3  ;;  %v659_v38 = vadd.f32 0.5, %v595_v26  ;;  %v596_v41 = vmul.f32 0.5, %v2005_v63  ;;  %2018 = vtanh.f32 %v475_v43  ;;  %v285_v29 = vunpack.c.l.b16 %v227_v35 }
  0x94   : > { %v2007_v59 = vpop.eup %2006  ;;  %722 = vst [vmem:[%s2709_s21 + $0x138] sm:$0xff] %v658_v54  ;;  %2020 = vtanh.f32 %v476_v2  ;;  %v477_v31 = vadd.f32 %v2608_v33, %v412_v60  ;;  %v413_v45 = vmul.f32 %v2602_v28, %v2913_v7  ;;  %v286_v4 = vunpack.c.h.b16 %v227_v35 }
  0x95   : > { %723 = vst [vmem:[%s2709_s21 + $0x140] sm:$0xff] %v659_v38  ;;  %v660_v58 = vadd.f32 0.5, %v596_v41  ;;  %v597_v40 = vmul.f32 0.5, %v2007_v59  ;;  %v2923_v39 = vcvt.s32.f32 %v285_v29  ;;  %v287_v26 = vunpack.c.l.b16 %v228_v10 }
  0x96   : > { %2022 = vtanh.f32 %v477_v31  ;;  %v478_v3 = vadd.f32 %v2608_v33, %v413_v45  ;;  %v2926_v43 = vcvt.s32.f32 %v286_v4  ;;  %v288_v2 = vunpack.c.h.b16 %v228_v10 }
  0x97   : > { %3671 = vst [vmem:[#allocation31_spill] sm:$0xff] %v2923_v39  ;;  %v2009_v63 = vpop.eup %2008  ;;  %724 = vst [vmem:[%s2709_s21 + $0x148] sm:$0xff] %v660_v58  ;;  %v661_v54 = vadd.f32 0.5, %v597_v40  ;;  %v414_v35 = vmul.f32 %v2602_v28, %v2923_v39  ;;  %v2931_v60 = vcvt.s32.f32 %v287_v26  ;;  %v289_v38 = vunpack.c.l.b16 %v229_v36  ;;  %v230_v40 = vld [vmem:[%s2568_s8 + $0xe8] sm:$0xff] }
  0x98   : > { %3672 = vst [vmem:[#allocation32_spill] sm:$0xff] %v2926_v43  ;;  %v2011_v41 = vpop.eup %2010  ;;  %v598_v29 = vmul.f32 0.5, %v2009_v63  ;;  %2024 = vtanh.f32 %v478_v3  ;;  %v415_v59 = vmul.f32 %v2602_v28, %v2926_v43  ;;  %v2935_v31 = vcvt.s32.f32 %v288_v2 }
  0x99   : > { %3673 = vst [vmem:[#allocation33_spill] sm:$0xff] %v2931_v60  ;;  %725 = vst [vmem:[%s2709_s21 + $0x150] sm:$0xff] %v661_v54  ;;  %v599_v10 = vmul.f32 0.5, %v2011_v41  ;;  %v479_v45 = vadd.f32 %v2608_v33, %v414_v35  ;;  %v416_v4 = vmul.f32 %v2602_v28, %v2931_v60  ;;  %v2941_v58 = vcvt.s32.f32 %v289_v38 }
  0x9a   : > { %3674 = vst [vmem:[#allocation34_spill] sm:$0xff] %v2935_v31  ;;  %v662_v26 = vadd.f32 0.5, %v598_v29  ;;  %v480_v3 = vadd.f32 %v2608_v33, %v415_v59  ;;  %v417_v2 = vmul.f32 %v2602_v28, %v2935_v31  ;;  %v290_v63 = vunpack.c.h.b16 %v229_v36  ;;  %v231_v59 = vld [vmem:[%s2568_s8 + $0xf0] sm:$0xff] }
  0x9b   : > { %3675 = vst [vmem:[#allocation35_spill] sm:$0xff] %v2941_v58  ;;  %v663_v43 = vadd.f32 0.5, %v599_v10  ;;  %2026 = vtanh.f32 %v479_v45  ;;  %v481_v54 = vadd.f32 %v2608_v33, %v416_v4  ;;  %v418_v35 = vmul.f32 %v2602_v28, %v2941_v58 }
  0x9c   : > { %v2013_v41 = vpop.eup %2012  ;;  %726 = vst [vmem:[%s2709_s21 + $0x158] sm:$0xff] %v662_v26  ;;  %2028 = vtanh.f32 %v480_v3  ;;  %v482_v38 = vadd.f32 %v2608_v33, %v417_v2  ;;  %v2952_v29 = vcvt.s32.f32 %v290_v63  ;;  %v291_v60 = vunpack.c.l.b16 %v230_v40 }
  0x9d   : > { %v2015_v39 = vpop.eup %2014  ;;  %727 = vst [vmem:[%s2709_s21 + $0x160] sm:$0xff] %v663_v43  ;;  %v600_v31 = vmul.f32 0.5, %v2013_v41  ;;  %2030 = vtanh.f32 %v481_v54  ;;  %v483_v36 = vadd.f32 %v2608_v33, %v418_v35  ;;  %v292_v10 = vunpack.c.h.b16 %v230_v40 }
  0x9e   : > { %3676 = vst [vmem:[#allocation36_spill] sm:$0xff] %v2952_v29  ;;  %v601_v45 = vmul.f32 0.5, %v2015_v39  ;;  %2032 = vtanh.f32 %v482_v38  ;;  %v419_v4 = vmul.f32 %v2602_v28, %v2952_v29  ;;  %v2959_v26 = vcvt.s32.f32 %v291_v60  ;;  %v232_v29 = vld [vmem:[%s2568_s8 + $0xf8] sm:$0xff] }
  0x9f   : > { %v2017_v3 = vpop.eup %2016  ;;  %v664_v2 = vadd.f32 0.5, %v600_v31  ;;  %2034 = vtanh.f32 %v483_v36  ;;  %v2963_v43 = vcvt.s32.f32 %v292_v10  ;;  %v293_v63 = vunpack.c.l.b16 %v231_v59 }
  0xa0   : > { %3677 = vst [vmem:[#allocation37_spill] sm:$0xff] %v2959_v26  ;;  %v2019_v54 = vpop.eup %2018  ;;  %v665_v40 = vadd.f32 0.5, %v601_v45  ;;  %v602_v39 = vmul.f32 0.5, %v2017_v3  ;;  %v484_v35 = vadd.f32 %v2608_v33, %v419_v4  ;;  %v420_v41 = vmul.f32 %v2602_v28, %v2959_v26 }
  0xa1   : > { %3678 = vst [vmem:[#allocation38_spill] sm:$0xff] %v2963_v43  ;;  %v2021_v60 = vpop.eup %2020  ;;  %728 = vst [vmem:[%s2709_s21 + $0x168] sm:$0xff] %v664_v2  ;;  %v603_v31 = vmul.f32 0.5, %v2019_v54  ;;  %v421_v38 = vmul.f32 %v2602_v28, %v2963_v43  ;;  %v2973_v36 = vcvt.s32.f32 %v293_v63  ;;  %v294_v10 = vunpack.c.h.b16 %v231_v59 }
  0xa2   : > { %729 = vst [vmem:[%s2709_s21 + $0x170] sm:$0xff] %v665_v40  ;;  %v666_v45 = vadd.f32 0.5, %v602_v39  ;;  %v604_v4 = vmul.f32 0.5, %v2021_v60  ;;  %2036 = vtanh.f32 %v484_v35  ;;  %v485_v3 = vadd.f32 %v2608_v33, %v420_v41 }
  0xa3   : > { %3679 = vst [vmem:[#allocation39_spill] sm:$0xff] %v2973_v36  ;;  %v2023_v26 = vpop.eup %2022  ;;  %v667_v58 = vadd.f32 0.5, %v603_v31  ;;  %v486_v2 = vadd.f32 %v2608_v33, %v421_v38  ;;  %v422_v54 = vmul.f32 %v2602_v28, %v2973_v36  ;;  %v2981_v43 = vcvt.s32.f32 %v294_v10 }
  0xa4   : > { %730 = vst [vmem:[%s2709_s21 + $0x178] sm:$0xff] %v666_v45  ;;  %v668_v59 = vadd.f32 0.5, %v604_v4  ;;  %v605_v63 = vmul.f32 0.5, %v2023_v26  ;;  %2038 = vtanh.f32 %v485_v3  ;;  %v295_v40 = vunpack.c.l.b16 %v232_v29 }
  0xa5   : > { %v2025_v39 = vpop.eup %2024  ;;  %731 = vst [vmem:[%s2709_s21 + $0x180] sm:$0xff] %v667_v58  ;;  %2040 = vtanh.f32 %v486_v2  ;;  %v487_v35 = vadd.f32 %v2608_v33, %v422_v54  ;;  %v423_v41 = vmul.f32 %v2602_v28, %v2981_v43  ;;  %v296_v60 = vunpack.c.h.b16 %v232_v29 }
  0xa6   : > { %732 = vst [vmem:[%s2709_s21 + $0x188] sm:$0xff] %v668_v59  ;;  %v669_v31 = vadd.f32 0.5, %v605_v63  ;;  %v606_v38 = vmul.f32 0.5, %v2025_v39  ;;  %v2989_v10 = vcvt.s32.f32 %v295_v40  ;;  %v2992_v45 = vstv %s2961_s24 }
  0xa7   : > { %2042 = vtanh.f32 %v487_v35  ;;  %v488_v26 = vadd.f32 %v2608_v33, %v423_v41  ;;  %v2995_v58 = vcvt.s32.f32 %v296_v60  ;;  %v748_v4 = vmul.f32 %v2992_v45, %v2582_v14 }
  0xa8   : > { %3680 = vst [vmem:[#allocation40_spill] sm:$0xff] %v2989_v10  ;;  %v2027_v3 = vpop.eup %2026  ;;  %733 = vst [vmem:[%s2709_s21 + $0x190] sm:$0xff] %v669_v31  ;;  %v670_v2 = vadd.f32 0.5, %v606_v38  ;;  %v424_v29 = vmul.f32 %v2602_v28, %v2989_v10  ;;  %v3003_v54 = vstv %s2968_s25  ;;  %v749_v59 = vmul.f32 %v2992_v45, %v2584_v15 }
  0xa9   : > { %3681 = vst [vmem:[#allocation41_spill] sm:$0xff] %v2995_v58  ;;  %v2029_v63 = vpop.eup %2028  ;;  %v607_v40 = vmul.f32 0.5, %v2027_v3  ;;  %2044 = vtanh.f32 %v488_v26  ;;  %v425_v39 = vmul.f32 %v2602_v28, %v2995_v58  ;;  %v813_v35 = vadd.f32 %v3003_v54, %v748_v4 }
  0xaa   : > { %v2031_v41 = vpop.eup %2030  ;;  %734 = vst [vmem:[%s2709_s21 + $0x198] sm:$0xff] %v670_v2  ;;  %v608_v60 = vmul.f32 0.5, %v2029_v63  ;;  %v489_v31 = vadd.f32 %v2608_v33, %v424_v29  ;;  %v814_v38 = vadd.f32 %v3003_v54, %v749_v59  ;;  %v750_v14 = vmul.f32 %v2992_v45, %v2586_v16 }
  0xab   : > { %v2033_v15 = vpop.eup %2032  ;;  %v671_v3 = vadd.f32 0.5, %v607_v40  ;;  %v609_v26 = vmul.f32 0.5, %v2031_v41  ;;  %v490_v10 = vadd.f32 %v2608_v33, %v425_v39  ;;  %2046 = vtanh.f32 %v813_v35 }
  0xac   : > { %v2035_v28 = vpop.eup %2034  ;;  %v672_v4 = vadd.f32 0.5, %v608_v60  ;;  %v610_v58 = vmul.f32 0.5, %v2033_v15  ;;  %2048 = vtanh.f32 %v489_v31  ;;  %v815_v2 = vadd.f32 %v3003_v54, %v750_v14 }
  0xad   : > { %735 = vst [vmem:[%s2709_s21 + $0x1a0] sm:$0xff] %v671_v3  ;;  %v673_v29 = vadd.f32 0.5, %v609_v26  ;;  %v611_v59 = vmul.f32 0.5, %v2035_v28  ;;  %2050 = vtanh.f32 %v490_v10  ;;  %v751_v63 = vmul.f32 %v2992_v45, %v2588_v17 }
  0xae   : > { %736 = vst [vmem:[%s2709_s21 + $0x1a8] sm:$0xff] %v672_v4  ;;  %v674_v40 = vadd.f32 0.5, %v610_v58  ;;  %2052 = vtanh.f32 %v814_v38  ;;  %v752_v33 = vmul.f32 %v2992_v45, %v2594_v20  ;;  %v753_v15 = vmul.f32 %v2992_v45, %v2596_v21 }
  0xaf   : > { %v2037_v39 = vpop.eup %2036  ;;  %737 = vst [vmem:[%s2709_s21 + $0x1b0] sm:$0xff] %v673_v29  ;;  %v675_v14 = vadd.f32 0.5, %v611_v59  ;;  %2054 = vtanh.f32 %v815_v2  ;;  %v816_v35 = vadd.f32 %v3003_v54, %v751_v63  ;;  %v754_v10 = vmul.f32 %v2992_v45, %v2598_v22 }
  0xb0   : > { %738 = vst [vmem:[%s2709_s21 + $0x1b8] sm:$0xff] %v674_v40  ;;  %v612_v41 = vmul.f32 0.5, %v2037_v39  ;;  %v817_v58 = vadd.f32 %v3003_v54, %v752_v33  ;;  %v818_v60 = vadd.f32 %v3003_v54, %v753_v15  ;;  %v755_v31 = vmul.f32 %v2992_v45, %v2600_v23 }
  0xb1   : > { %v2039_v38 = vpop.eup %2038  ;;  %739 = vst [vmem:[%s2709_s21 + $0x1c0] sm:$0xff] %v675_v14  ;;  %2056 = vtanh.f32 %v816_v35  ;;  %v819_v3 = vadd.f32 %v3003_v54, %v754_v10  ;;  %v756_v26 = vmul.f32 %v2992_v45, %v2632_v49  ;;  %v757_v28 = vmul.f32 %v2992_v45, %v2634_v50 }
  0xb2   : > { %v2041_v4 = vpop.eup %2040  ;;  %v676_v2 = vadd.f32 0.5, %v612_v41  ;;  %v613_v29 = vmul.f32 0.5, %v2039_v38  ;;  %2058 = vtanh.f32 %v817_v58  ;;  %v820_v59 = vadd.f32 %v3003_v54, %v755_v31 }
  0xb3   : > { %v614_v63 = vmul.f32 0.5, %v2041_v4  ;;  %2060 = vtanh.f32 %v818_v60  ;;  %v821_v40 = vadd.f32 %v3003_v54, %v756_v26  ;;  %v822_v33 = vadd.f32 %v3003_v54, %v757_v28 }
  0xb4   : > { %v2043_v15 = vpop.eup %2042  ;;  %740 = vst [vmem:[%s2709_s21 + $0x1c8] sm:$0xff] %v676_v2  ;;  %v677_v39 = vadd.f32 0.5, %v613_v29  ;;  %2062 = vtanh.f32 %v819_v3  ;;  %v758_v14 = vmul.f32 %v2992_v45, %v2636_v51  ;;  %v759_v35 = vmul.f32 %v2992_v45, %v2638_v52 }
  0xb5   : > { %v678_v10 = vadd.f32 0.5, %v614_v63  ;;  %v615_v41 = vmul.f32 0.5, %v2043_v15  ;;  %2064 = vtanh.f32 %v820_v59  ;;  %v760_v58 = vmul.f32 %v2992_v45, %v2640_v53 }
  0xb6   : > { %v2045_v60 = vpop.eup %2044  ;;  %741 = vst [vmem:[%s2709_s21 + $0x1d0] sm:$0xff] %v677_v39  ;;  %2066 = vtanh.f32 %v821_v40  ;;  %v823_v31 = vadd.f32 %v3003_v54, %v758_v14  ;;  %v824_v38 = vadd.f32 %v3003_v54, %v759_v35  ;;  %v761_v3 = vmul.f32 %v2992_v45, %v2646_v56 }
  0xb7   : > { %742 = vst [vmem:[%s2709_s21 + $0x1d8] sm:$0xff] %v678_v10  ;;  %v679_v26 = vadd.f32 0.5, %v615_v41  ;;  %v616_v28 = vmul.f32 0.5, %v2045_v60  ;;  %2068 = vtanh.f32 %v822_v33  ;;  %v825_v4 = vadd.f32 %v3003_v54, %v760_v58 }
  0xb8   : > { %v2047_v2 = vpop.eup %2046  ;;  %2070 = vtanh.f32 %v823_v31  ;;  %v826_v29 = vadd.f32 %v3003_v54, %v761_v3  ;;  %v762_v59 = vmul.f32 %v2992_v45, %v2664_v5  ;;  %v763_v63 = vmul.f32 %v2992_v45, %v2669_v11 }
  0xb9   : > { %v2049_v40 = vpop.eup %2048  ;;  %743 = vst [vmem:[%s2709_s21 + $0x1e0] sm:$0xff] %v679_v26  ;;  %v680_v15 = vadd.f32 0.5, %v616_v28  ;;  %v941_v39 = vmul.f32 0.5, %v2047_v2  ;;  %2072 = vtanh.f32 %v824_v38  ;;  %v764_v33 = vmul.f32 %v2992_v45, %v2671_v13 }
  0xba   : > { %v2051_v14 = vpop.eup %2050  ;;  %v617_v35 = vmul.f32 0.5, %v2049_v40  ;;  %2074 = vtanh.f32 %v825_v4  ;;  %v827_v10 = vadd.f32 %v3003_v54, %v762_v59  ;;  %v828_v41 = vadd.f32 %v3003_v54, %v763_v63 }
  0xbb   : > { %v2053_v58 = vpop.eup %2052  ;;  %744 = vst [vmem:[%s2709_s21 + $0x1e8] sm:$0xff] %v680_v15  ;;  %v618_v60 = vmul.f32 0.5, %v2051_v14  ;;  %v1005_v31 = vadd.f32 0.5, %v941_v39  ;;  %2076 = vtanh.f32 %v826_v29  ;;  %v829_v3 = vadd.f32 %v3003_v54, %v764_v33 }
  0xbc   : > { %v2055_v38 = vpop.eup %2054  ;;  %v681_v26 = vadd.f32 0.5, %v617_v35  ;;  %v942_v28 = vmul.f32 0.5, %v2053_v58  ;;  %2078 = vtanh.f32 %v827_v10  ;;  %v765_v4 = vmul.f32 %v2992_v45, %v2673_v18 }
  0xbd   : > { %v682_v2 = vadd.f32 0.5, %v618_v60  ;;  %1681 = vst [vmem:[%s2709_s21 + $0x200] sm:$0xff] %v1005_v31  ;;  %v943_v59 = vmul.f32 0.5, %v2055_v38  ;;  %2080 = vtanh.f32 %v828_v41  ;;  %v766_v63 = vmul.f32 %v2992_v45, %v2675_v24 }
  0xbe   : > { %v2057_v40 = vpop.eup %2056  ;;  %745 = vst [vmem:[%s2709_s21 + $0x1f0] sm:$0xff] %v681_v26  ;;  %v1006_v29 = vadd.f32 0.5, %v942_v28  ;;  %2082 = vtanh.f32 %v829_v3  ;;  %v830_v15 = vadd.f32 %v3003_v54, %v765_v4  ;;  %v767_v39 = vmul.f32 %v2992_v45, %v2681_v27 }
  0xbf   : > { %v2059_v33 = vpop.eup %2058  ;;  %746 = vst [vmem:[%s2709_s21 + $0x1f8] sm:$0xff] %v682_v2  ;;  %v1007_v14 = vadd.f32 0.5, %v943_v59  ;;  %v944_v35 = vmul.f32 0.5, %v2057_v40  ;;  %v831_v10 = vadd.f32 %v3003_v54, %v766_v63  ;;  %v768_v41 = vmul.f32 %v2992_v45, %v2700_v44 }
  0xc0   : > { %v2061_v58 = vpop.eup %2060  ;;  %1682 = vst [vmem:[%s2709_s21 + $0x208] sm:$0xff] %v1006_v29  ;;  %v945_v60 = vmul.f32 0.5, %v2059_v33  ;;  %2084 = vtanh.f32 %v830_v15  ;;  %v832_v31 = vadd.f32 %v3003_v54, %v767_v39  ;;  %v769_v3 = vmul.f32 %v2992_v45, %v2705_v62 }
  0xc1   : > { %v2063_v38 = vpop.eup %2062  ;;  %1683 = vst [vmem:[%s2709_s21 + $0x210] sm:$0xff] %v1007_v14  ;;  %v1008_v26 = vadd.f32 0.5, %v944_v35  ;;  %v946_v28 = vmul.f32 0.5, %v2061_v58  ;;  %2086 = vtanh.f32 %v831_v10  ;;  %v833_v4 = vadd.f32 %v3003_v54, %v768_v41 }
  0xc2   : > { %v2065_v2 = vpop.eup %2064  ;;  %v1009_v59 = vadd.f32 0.5, %v945_v60  ;;  %v947_v63 = vmul.f32 0.5, %v2063_v38  ;;  %2088 = vtanh.f32 %v832_v31  ;;  %v834_v40 = vadd.f32 %v3003_v54, %v769_v3 }
  0xc3   : > { %v2067_v29 = vpop.eup %2066  ;;  %1684 = vst [vmem:[%s2709_s21 + $0x218] sm:$0xff] %v1008_v26  ;;  %v1010_v15 = vadd.f32 0.5, %v946_v28  ;;  %v948_v39 = vmul.f32 0.5, %v2065_v2  ;;  %2090 = vtanh.f32 %v833_v4  ;;  %v770_v33 = vmul.f32 %v2992_v45, %v2718_v19 }
  0xc4   : > { %v2069_v14 = vpop.eup %2068  ;;  %1685 = vst [vmem:[%s2709_s21 + $0x220] sm:$0xff] %v1009_v59  ;;  %v1011_v35 = vadd.f32 0.5, %v947_v63  ;;  %v949_v10 = vmul.f32 0.5, %v2067_v29  ;;  %2092 = vtanh.f32 %v834_v40  ;;  %v771_v41 = vmul.f32 %v2992_v45, %v2727_v42 }
  0xc5   : > { %v2071_v58 = vpop.eup %2070  ;;  %1686 = vst [vmem:[%s2709_s21 + $0x228] sm:$0xff] %v1010_v15  ;;  %v1012_v60 = vadd.f32 0.5, %v948_v39  ;;  %v950_v31 = vmul.f32 0.5, %v2069_v14  ;;  %v835_v3 = vadd.f32 %v3003_v54, %v770_v33  ;;  %v772_v38 = vmul.f32 %v2992_v45, %v2731_v47 }
  0xc6   : > { %v2073_v26 = vpop.eup %2072  ;;  %1687 = vst [vmem:[%s2709_s21 + $0x230] sm:$0xff] %v1011_v35  ;;  %v1013_v28 = vadd.f32 0.5, %v949_v10  ;;  %v951_v4 = vmul.f32 0.5, %v2071_v58  ;;  %v836_v2 = vadd.f32 %v3003_v54, %v771_v41  ;;  %v773_v59 = vmul.f32 %v2992_v45, %v2742_v6 }
  0xc7   : > { %v2075_v63 = vpop.eup %2074  ;;  %1688 = vst [vmem:[%s2709_s21 + $0x238] sm:$0xff] %v1012_v60  ;;  %v1014_v40 = vadd.f32 0.5, %v950_v31  ;;  %v952_v29 = vmul.f32 0.5, %v2073_v26  ;;  %2094 = vtanh.f32 %v835_v3  ;;  %v837_v15 = vadd.f32 %v3003_v54, %v772_v38 }
  0xc8   : > { %v2077_v39 = vpop.eup %2076  ;;  %1689 = vst [vmem:[%s2709_s21 + $0x240] sm:$0xff] %v1013_v28  ;;  %v1015_v33 = vadd.f32 0.5, %v951_v4  ;;  %v953_v14 = vmul.f32 0.5, %v2075_v63  ;;  %2096 = vtanh.f32 %v836_v2  ;;  %v838_v35 = vadd.f32 %v3003_v54, %v773_v59 }
  0xc9   : > { %v2079_v10 = vpop.eup %2078  ;;  %1690 = vst [vmem:[%s2709_s21 + $0x248] sm:$0xff] %v1014_v40  ;;  %v1016_v41 = vadd.f32 0.5, %v952_v29  ;;  %v954_v58 = vmul.f32 0.5, %v2077_v39  ;;  %2098 = vtanh.f32 %v837_v15  ;;  %v774_v60 = vmul.f32 %v2992_v45, %v2751_v37 }
  0xca   : > { %v2081_v31 = vpop.eup %2080  ;;  %1691 = vst [vmem:[%s2709_s21 + $0x250] sm:$0xff] %v1015_v33  ;;  %v1017_v3 = vadd.f32 0.5, %v953_v14  ;;  %v955_v38 = vmul.f32 0.5, %v2079_v10  ;;  %2100 = vtanh.f32 %v838_v35  ;;  %v775_v26 = vmul.f32 %v2992_v45, %v2760_v61 }
  0xcb   : > { %v2083_v28 = vpop.eup %2082  ;;  %1692 = vst [vmem:[%s2709_s21 + $0x258] sm:$0xff] %v1016_v41  ;;  %v1018_v4 = vadd.f32 0.5, %v954_v58  ;;  %v956_v2 = vmul.f32 0.5, %v2081_v31  ;;  %v839_v59 = vadd.f32 %v3003_v54, %v774_v60  ;;  %v776_v63 = vmul.f32 %v2992_v45, %v2764_v1 }
  0xcc   : > { %1693 = vst [vmem:[%s2709_s21 + $0x260] sm:$0xff] %v1017_v3  ;;  %v1019_v40 = vadd.f32 0.5, %v955_v38  ;;  %v957_v29 = vmul.f32 0.5, %v2083_v28  ;;  %v840_v15 = vadd.f32 %v3003_v54, %v775_v26  ;;  %v777_v39 = vmul.f32 %v2992_v45, %v2775_v30 }
  0xcd   : > { %v2085_v33 = vpop.eup %2084  ;;  %1694 = vst [vmem:[%s2709_s21 + $0x268] sm:$0xff] %v1018_v4  ;;  %v1020_v14 = vadd.f32 0.5, %v956_v2  ;;  %2102 = vtanh.f32 %v839_v59  ;;  %v841_v35 = vadd.f32 %v3003_v54, %v776_v63  ;;  %v778_v10 = vmul.f32 %v2992_v45, %v2777_v32 }
  0xce   : > { %v2087_v41 = vpop.eup %2086  ;;  %1695 = vst [vmem:[%s2709_s21 + $0x270] sm:$0xff] %v1019_v40  ;;  %v1021_v58 = vadd.f32 0.5, %v957_v29  ;;  %v958_v60 = vmul.f32 0.5, %v2085_v33  ;;  %2104 = vtanh.f32 %v840_v15  ;;  %v842_v31 = vadd.f32 %v3003_v54, %v777_v39 }
  0xcf   : > { %v2089_v3 = vpop.eup %2088  ;;  %1696 = vst [vmem:[%s2709_s21 + $0x278] sm:$0xff] %v1020_v14  ;;  %v959_v38 = vmul.f32 0.5, %v2087_v41  ;;  %2106 = vtanh.f32 %v841_v35  ;;  %v843_v26 = vadd.f32 %v3003_v54, %v778_v10  ;;  %v779_v28 = vmul.f32 %v2992_v45, %v2781_v34 }
  0xd0   : > { %v2091_v4 = vpop.eup %2090  ;;  %1697 = vst [vmem:[%s2709_s21 + $0x280] sm:$0xff] %v1021_v58  ;;  %v1022_v2 = vadd.f32 0.5, %v958_v60  ;;  %v960_v59 = vmul.f32 0.5, %v2089_v3  ;;  %2108 = vtanh.f32 %v842_v31  ;;  %v780_v63 = vmul.f32 %v2992_v45, %v2790_v48 }
  0xd1   : > { %v2093_v40 = vpop.eup %2092  ;;  %v1023_v29 = vadd.f32 0.5, %v959_v38  ;;  %v961_v15 = vmul.f32 0.5, %v2091_v4  ;;  %2110 = vtanh.f32 %v843_v26  ;;  %v844_v39 = vadd.f32 %v3003_v54, %v779_v28 }
  0xd2   : > { %1698 = vst [vmem:[%s2709_s21 + $0x288] sm:$0xff] %v1022_v2  ;;  %v1024_v33 = vadd.f32 0.5, %v960_v59  ;;  %v962_v14 = vmul.f32 0.5, %v2093_v40  ;;  %v845_v35 = vadd.f32 %v3003_v54, %v780_v63  ;;  %v781_v10 = vmul.f32 %v2992_v45, %v2795_v57 }
  0xd3   : > { %1699 = vst [vmem:[%s2709_s21 + $0x290] sm:$0xff] %v1023_v29  ;;  %v1025_v41 = vadd.f32 0.5, %v961_v15  ;;  %2112 = vtanh.f32 %v844_v39  ;;  %v782_v58 = vmul.f32 %v2992_v45, %v2802_v8  ;;  %v783_v60 = vmul.f32 %v2992_v45, %v2807_v25 }
  0xd4   : > { %v2095_v31 = vpop.eup %2094  ;;  %1700 = vst [vmem:[%s2709_s21 + $0x298] sm:$0xff] %v1024_v33  ;;  %v1026_v3 = vadd.f32 0.5, %v962_v14  ;;  %2114 = vtanh.f32 %v845_v35  ;;  %v846_v38 = vadd.f32 %v3003_v54, %v781_v10  ;;  %v784_v26 = vmul.f32 %v2992_v45, %v2820_v55 }
  0xd5   : > { %v2097_v28 = vpop.eup %2096  ;;  %1701 = vst [vmem:[%s2709_s21 + $0x2a0] sm:$0xff] %v1025_v41  ;;  %v963_v4 = vmul.f32 0.5, %v2095_v31  ;;  %v847_v2 = vadd.f32 %v3003_v54, %v782_v58  ;;  %v848_v59 = vadd.f32 %v3003_v54, %v783_v60  ;;  %v785_v63 = vmul.f32 %v2992_v45, %v2822_v0 }
  0xd6   : > { %v2099_v40 = vpop.eup %2098  ;;  %1702 = vst [vmem:[%s2709_s21 + $0x2a8] sm:$0xff] %v1026_v3  ;;  %v964_v29 = vmul.f32 0.5, %v2097_v28  ;;  %2116 = vtanh.f32 %v846_v38  ;;  %v849_v15 = vadd.f32 %v3003_v54, %v784_v26  ;;  %v786_v39 = vmul.f32 %v2992_v45, %v2827_v9  ;;  %v3682_v38 = vld [vmem:[#allocation20_spill] sm:$0xff] }
  0xd7   : > { %v2101_v33 = vpop.eup %2100  ;;  %v1027_v14 = vadd.f32 0.5, %v963_v4  ;;  %v965_v35 = vmul.f32 0.5, %v2099_v40  ;;  %2118 = vtanh.f32 %v847_v2  ;;  %v850_v10 = vadd.f32 %v3003_v54, %v785_v63  ;;  %v3683_v2 = vld [vmem:[#allocation21_spill] sm:$0xff] }
  0xd8   : > { %v1028_v41 = vadd.f32 0.5, %v964_v29  ;;  %v966_v58 = vmul.f32 0.5, %v2101_v33  ;;  %2120 = vtanh.f32 %v848_v59  ;;  %v851_v60 = vadd.f32 %v3003_v54, %v786_v39  ;;  %v3684_v59 = vld [vmem:[#allocation22_spill] sm:$0xff] }
  0xd9   : > { %1703 = vst [vmem:[%s2709_s21 + $0x2b0] sm:$0xff] %v1027_v14  ;;  %v1029_v31 = vadd.f32 0.5, %v965_v35  ;;  %2122 = vtanh.f32 %v849_v15  ;;  %v787_v3 = vmul.f32 %v2992_v45, %v2832_v12  ;;  %v788_v26 = vmul.f32 %v2992_v45, %v3682_v38 }
  0xda   : > { %v2103_v28 = vpop.eup %2102  ;;  %1704 = vst [vmem:[%s2709_s21 + $0x2b8] sm:$0xff] %v1028_v41  ;;  %v1030_v4 = vadd.f32 0.5, %v966_v58  ;;  %2124 = vtanh.f32 %v850_v10  ;;  %v789_v63 = vmul.f32 %v2992_v45, %v3683_v2  ;;  %v790_v40 = vmul.f32 %v2992_v45, %v3684_v59  ;;  %v3685_v58 = vld [vmem:[#allocation23_spill] sm:$0xff] }
  0xdb   : > { %v2105_v29 = vpop.eup %2104  ;;  %1705 = vst [vmem:[%s2709_s21 + $0x2c0] sm:$0xff] %v1029_v31  ;;  %v967_v15 = vmul.f32 0.5, %v2103_v28  ;;  %2126 = vtanh.f32 %v851_v60  ;;  %v852_v39 = vadd.f32 %v3003_v54, %v787_v3  ;;  %v853_v33 = vadd.f32 %v3003_v54, %v788_v26  ;;  %v3686_v60 = vld [vmem:[#allocation24_spill] sm:$0xff] }
  0xdc   : > { %v2107_v14 = vpop.eup %2106  ;;  %1706 = vst [vmem:[%s2709_s21 + $0x2c8] sm:$0xff] %v1030_v4  ;;  %v968_v35 = vmul.f32 0.5, %v2105_v29  ;;  %v854_v10 = vadd.f32 %v3003_v54, %v789_v63  ;;  %v855_v41 = vadd.f32 %v3003_v54, %v790_v40  ;;  %v791_v2 = vmul.f32 %v2992_v45, %v3685_v58 }
  0xdd   : > { %v2109_v59 = vpop.eup %2108  ;;  %v1031_v31 = vadd.f32 0.5, %v967_v15  ;;  %v969_v28 = vmul.f32 0.5, %v2107_v14  ;;  %2128 = vtanh.f32 %v852_v39  ;;  %v792_v3 = vmul.f32 %v2992_v45, %v3686_v60  ;;  %v3687_v14 = vld [vmem:[#allocation25_spill] sm:$0xff]  ;;  %v3688_v60 = vld [vmem:[#allocation26_spill] sm:$0xff] }
  0xde   : > { %v2111_v26 = vpop.eup %2110  ;;  %v1032_v38 = vadd.f32 0.5, %v968_v35  ;;  %v970_v4 = vmul.f32 0.5, %v2109_v59  ;;  %2130 = vtanh.f32 %v853_v33  ;;  %v856_v63 = vadd.f32 %v3003_v54, %v791_v2 }
  0xdf   : > { %1707 = vst [vmem:[%s2709_s21 + $0x2d0] sm:$0xff] %v1031_v31  ;;  %v1033_v40 = vadd.f32 0.5, %v969_v28  ;;  %v971_v29 = vmul.f32 0.5, %v2111_v26  ;;  %2132 = vtanh.f32 %v854_v10  ;;  %v857_v58 = vadd.f32 %v3003_v54, %v792_v3  ;;  %v3689_v28 = vld [vmem:[#allocation27_spill] sm:$0xff] }
  0xe0   : > { %v2113_v15 = vpop.eup %2112  ;;  %1708 = vst [vmem:[%s2709_s21 + $0x2d8] sm:$0xff] %v1032_v38  ;;  %v1034_v39 = vadd.f32 0.5, %v970_v4  ;;  %2134 = vtanh.f32 %v855_v41  ;;  %v793_v35 = vmul.f32 %v2992_v45, %v3687_v14  ;;  %v794_v59 = vmul.f32 %v2992_v45, %v3688_v60 }
  0xe1   : > { %v2115_v33 = vpop.eup %2114  ;;  %1709 = vst [vmem:[%s2709_s21 + $0x2e0] sm:$0xff] %v1033_v40  ;;  %v1035_v2 = vadd.f32 0.5, %v971_v29  ;;  %v972_v31 = vmul.f32 0.5, %v2113_v15  ;;  %2136 = vtanh.f32 %v856_v63  ;;  %v795_v10 = vmul.f32 %v2992_v45, %v3689_v28  ;;  %v3690_v29 = vld [vmem:[#allocation28_spill] sm:$0xff] }
  0xe2   : > { %1710 = vst [vmem:[%s2709_s21 + $0x2e8] sm:$0xff] %v1034_v39  ;;  %v973_v3 = vmul.f32 0.5, %v2115_v33  ;;  %2138 = vtanh.f32 %v857_v58  ;;  %v858_v38 = vadd.f32 %v3003_v54, %v793_v35  ;;  %v859_v41 = vadd.f32 %v3003_v54, %v794_v59  ;;  %v3691_v58 = vld [vmem:[#allocation30_spill] sm:$0xff] }
  0xe3   : > { %v2117_v26 = vpop.eup %2116  ;;  %1711 = vst [vmem:[%s2709_s21 + $0x2f0] sm:$0xff] %v1035_v2  ;;  %v1036_v4 = vadd.f32 0.5, %v972_v31  ;;  %v860_v40 = vadd.f32 %v3003_v54, %v795_v10  ;;  %v796_v63 = vmul.f32 %v2992_v45, %v3690_v29  ;;  %v797_v15 = vmul.f32 %v2992_v45, %v2892_v46 }
  0xe4   : > { %v2119_v39 = vpop.eup %2118  ;;  %v1037_v33 = vadd.f32 0.5, %v973_v3  ;;  %v974_v28 = vmul.f32 0.5, %v2117_v26  ;;  %2140 = vtanh.f32 %v858_v38  ;;  %v798_v35 = vmul.f32 %v2992_v45, %v3691_v58 }
  0xe5   : > { %v2121_v59 = vpop.eup %2120  ;;  %1712 = vst [vmem:[%s2709_s21 + $0x2f8] sm:$0xff] %v1036_v4  ;;  %v975_v2 = vmul.f32 0.5, %v2119_v39  ;;  %2142 = vtanh.f32 %v859_v41  ;;  %v861_v31 = vadd.f32 %v3003_v54, %v796_v63  ;;  %v862_v10 = vadd.f32 %v3003_v54, %v797_v15  ;;  %v3692_v39 = vld [vmem:[#allocation31_spill] sm:$0xff] }
  0xe6   : > { %v2123_v29 = vpop.eup %2122  ;;  %1713 = vst [vmem:[%s2709_s21 + $0x300] sm:$0xff] %v1037_v33  ;;  %v1038_v46 = vadd.f32 0.5, %v974_v28  ;;  %v976_v60 = vmul.f32 0.5, %v2121_v59  ;;  %2144 = vtanh.f32 %v860_v40  ;;  %v863_v3 = vadd.f32 %v3003_v54, %v798_v35 }
  0xe7   : > { %v2125_v38 = vpop.eup %2124  ;;  %v1039_v26 = vadd.f32 0.5, %v975_v2  ;;  %v977_v58 = vmul.f32 0.5, %v2123_v29  ;;  %2146 = vtanh.f32 %v861_v31  ;;  %v799_v41 = vmul.f32 %v2992_v45, %v2913_v7  ;;  %v3694_v31 = vld [vmem:[#allocation33_spill] sm:$0xff] }
  0xe8   : > { %v2127_v4 = vpop.eup %2126  ;;  %1714 = vst [vmem:[%s2709_s21 + $0x308] sm:$0xff] %v1038_v46  ;;  %v1040_v63 = vadd.f32 0.5, %v976_v60  ;;  %v978_v15 = vmul.f32 0.5, %v2125_v38  ;;  %2148 = vtanh.f32 %v862_v10  ;;  %v800_v28 = vmul.f32 %v2992_v45, %v3692_v39  ;;  %v3693_v46 = vld [vmem:[#allocation32_spill] sm:$0xff] }
  0xe9   : > { %1715 = vst [vmem:[%s2709_s21 + $0x310] sm:$0xff] %v1039_v26  ;;  %v1041_v40 = vadd.f32 0.5, %v977_v58  ;;  %v979_v33 = vmul.f32 0.5, %v2127_v4  ;;  %2150 = vtanh.f32 %v863_v3  ;;  %v864_v29 = vadd.f32 %v3003_v54, %v799_v41  ;;  %v3695_v3 = vld [vmem:[#allocation34_spill] sm:$0xff] }
  0xea   : > { %v2129_v35 = vpop.eup %2128  ;;  %1716 = vst [vmem:[%s2709_s21 + $0x318] sm:$0xff] %v1040_v63  ;;  %v1042_v59 = vadd.f32 0.5, %v978_v15  ;;  %v865_v2 = vadd.f32 %v3003_v54, %v800_v28  ;;  %v801_v60 = vmul.f32 %v2992_v45, %v3693_v46  ;;  %v802_v10 = vmul.f32 %v2992_v45, %v3694_v31 }
  0xeb   : > { %v2131_v38 = vpop.eup %2130  ;;  %1717 = vst [vmem:[%s2709_s21 + $0x320] sm:$0xff] %v1041_v40  ;;  %v1043_v58 = vadd.f32 0.5, %v979_v33  ;;  %v980_v26 = vmul.f32 0.5, %v2129_v35  ;;  %2152 = vtanh.f32 %v864_v29  ;;  %v803_v41 = vmul.f32 %v2992_v45, %v3695_v3  ;;  %v3696_v29 = vld [vmem:[#allocation35_spill] sm:$0xff] }
  0xec   : > { %v2133_v4 = vpop.eup %2132  ;;  %1718 = vst [vmem:[%s2709_s21 + $0x328] sm:$0xff] %v1042_v59  ;;  %v981_v63 = vmul.f32 0.5, %v2131_v38  ;;  %2154 = vtanh.f32 %v865_v2  ;;  %v866_v15 = vadd.f32 %v3003_v54, %v801_v60  ;;  %v867_v28 = vadd.f32 %v3003_v54, %v802_v10  ;;  %v3697_v38 = vld [vmem:[#allocation36_spill] sm:$0xff] }
  0xed   : > { %v2135_v46 = vpop.eup %2134  ;;  %1719 = vst [vmem:[%s2709_s21 + $0x330] sm:$0xff] %v1043_v58  ;;  %v1044_v31 = vadd.f32 0.5, %v980_v26  ;;  %v982_v40 = vmul.f32 0.5, %v2133_v4  ;;  %v868_v33 = vadd.f32 %v3003_v54, %v803_v41  ;;  %v804_v35 = vmul.f32 %v2992_v45, %v3696_v29 }
  0xee   : > { %v2137_v3 = vpop.eup %2136  ;;  %v1045_v39 = vadd.f32 0.5, %v981_v63  ;;  %v983_v59 = vmul.f32 0.5, %v2135_v46  ;;  %2156 = vtanh.f32 %v866_v15  ;;  %v805_v2 = vmul.f32 %v2992_v45, %v3697_v38 }
  0xef   : > { %v2139_v60 = vpop.eup %2138  ;;  %1720 = vst [vmem:[%s2709_s21 + $0x338] sm:$0xff] %v1044_v31  ;;  %v1046_v10 = vadd.f32 0.5, %v982_v40  ;;  %v984_v58 = vmul.f32 0.5, %v2137_v3  ;;  %2158 = vtanh.f32 %v867_v28  ;;  %v869_v26 = vadd.f32 %v3003_v54, %v804_v35  ;;  %v3698_v3 = vld [vmem:[#allocation37_spill] sm:$0xff]  ;;  %v3699_v28 = vld [vmem:[#allocation38_spill] sm:$0xff] }
  0xf0   : > { %1721 = vst [vmem:[%s2709_s21 + $0x340] sm:$0xff] %v1045_v39  ;;  %v1047_v41 = vadd.f32 0.5, %v983_v59  ;;  %v985_v4 = vmul.f32 0.5, %v2139_v60  ;;  %2160 = vtanh.f32 %v868_v33  ;;  %v870_v46 = vadd.f32 %v3003_v54, %v805_v2 }
  0xf1   : > { %v2141_v63 = vpop.eup %2140  ;;  %1722 = vst [vmem:[%s2709_s21 + $0x348] sm:$0xff] %v1046_v10  ;;  %v1048_v31 = vadd.f32 0.5, %v984_v58  ;;  %2162 = vtanh.f32 %v869_v26  ;;  %v806_v15 = vmul.f32 %v2992_v45, %v3698_v3  ;;  %v807_v40 = vmul.f32 %v2992_v45, %v3699_v28 }
  0xf2   : > { %v2143_v39 = vpop.eup %2142  ;;  %1723 = vst [vmem:[%s2709_s21 + $0x350] sm:$0xff] %v1047_v41  ;;  %v1049_v35 = vadd.f32 0.5, %v985_v4  ;;  %v986_v33 = vmul.f32 0.5, %v2141_v63  ;;  %2164 = vtanh.f32 %v870_v46  ;;  %v808_v59 = vmul.f32 %v2992_v45, %v2973_v36  ;;  %v3700_v63 = vld [vmem:[#allocation40_spill] sm:$0xff] }
  0xf3   : > { %v2145_v2 = vpop.eup %2144  ;;  %1724 = vst [vmem:[%s2709_s21 + $0x358] sm:$0xff] %v1048_v31  ;;  %v987_v60 = vmul.f32 0.5, %v2143_v39  ;;  %v871_v10 = vadd.f32 %v3003_v54, %v806_v15  ;;  %v872_v58 = vadd.f32 %v3003_v54, %v807_v40  ;;  %v809_v26 = vmul.f32 %v2992_v45, %v2981_v43 }
  0xf4   : > { %v2147_v28 = vpop.eup %2146  ;;  %1725 = vst [vmem:[%s2709_s21 + $0x360] sm:$0xff] %v1049_v35  ;;  %v1050_v41 = vadd.f32 0.5, %v986_v33  ;;  %v988_v4 = vmul.f32 0.5, %v2145_v2  ;;  %v873_v46 = vadd.f32 %v3003_v54, %v808_v59  ;;  %v810_v36 = vmul.f32 %v2992_v45, %v3700_v63 }
  0xf5   : > { %v2149_v31 = vpop.eup %2148  ;;  %v1051_v39 = vadd.f32 0.5, %v987_v60  ;;  %v989_v3 = vmul.f32 0.5, %v2147_v28  ;;  %2166 = vtanh.f32 %v871_v10  ;;  %v874_v15 = vadd.f32 %v3003_v54, %v809_v26  ;;  %v3701_v60 = vld [vmem:[#allocation41_spill] sm:$0xff] }
  0xf6   : > { %v2151_v40 = vpop.eup %2150  ;;  %1726 = vst [vmem:[%s2709_s21 + $0x368] sm:$0xff] %v1050_v41  ;;  %v1052_v35 = vadd.f32 0.5, %v988_v4  ;;  %v990_v33 = vmul.f32 0.5, %v2149_v31  ;;  %2168 = vtanh.f32 %v872_v58  ;;  %v875_v59 = vadd.f32 %v3003_v54, %v810_v36 }
  0xf7   : > { %1727 = vst [vmem:[%s2709_s21 + $0x370] sm:$0xff] %v1051_v39  ;;  %v1053_v2 = vadd.f32 0.5, %v989_v3  ;;  %v991_v63 = vmul.f32 0.5, %v2151_v40  ;;  %2170 = vtanh.f32 %v873_v46  ;;  %v811_v28 = vmul.f32 %v2992_v45, %v3701_v60  ;;  %v3702_v39 = vld [vmem:[#allocation18_spill] sm:$0xff]  ;;  %v3703_v40 = vld [vmem:[#allocation19_spill] sm:$0xff] }
  0xf8   : > { %v2153_v10 = vpop.eup %2152  ;;  %1728 = vst [vmem:[%s2709_s21 + $0x378] sm:$0xff] %v1052_v35  ;;  %v1054_v26 = vadd.f32 0.5, %v990_v33  ;;  %2172 = vtanh.f32 %v874_v15  ;;  %v3264_v41 = vstv %s3233_s26  ;;  %v3267_v4 = vstv %s3237_s17 }
  0xf9   : > { %v2155_v58 = vpop.eup %2154  ;;  %1729 = vst [vmem:[%s2709_s21 + $0x380] sm:$0xff] %v1053_v2  ;;  %v1055_v36 = vadd.f32 0.5, %v991_v63  ;;  %v992_v31 = vmul.f32 0.5, %v2153_v10  ;;  %2174 = vtanh.f32 %v875_v59  ;;  %v876_v3 = vadd.f32 %v3003_v54, %v811_v28 }
  0xfa   : > { %1730 = vst [vmem:[%s2709_s21 + $0x388] sm:$0xff] %v1054_v26  ;;  %v993_v46 = vmul.f32 0.5, %v2155_v58  ;;  %v1135_v45 = vmul.f32 %v3264_v41, %v3702_v39  ;;  %v1136_v15 = vmul.f32 %v3264_v41, %v3703_v40  ;;  %v1137_v35 = vmul.f32 %v3264_v41, %v2586_v16 }
  0xfb   : > { %v2157_v33 = vpop.eup %2156  ;;  %1731 = vst [vmem:[%s2709_s21 + $0x390] sm:$0xff] %v1055_v36  ;;  %v1056_v2 = vadd.f32 0.5, %v992_v31  ;;  %2176 = vtanh.f32 %v876_v3  ;;  %v1138_v54 = vmul.f32 %v3264_v41, %v2588_v17  ;;  %v1139_v63 = vmul.f32 %v3264_v41, %v2594_v20 }
  0xfc   : > { %v2159_v59 = vpop.eup %2158  ;;  %v1057_v28 = vadd.f32 0.5, %v993_v46  ;;  %v994_v10 = vmul.f32 0.5, %v2157_v33  ;;  %v1200_v26 = vadd.f32 %v3267_v4, %v1135_v45  ;;  %v1201_v58 = vadd.f32 %v3267_v4, %v1136_v15 }
  0xfd   : > { %v2161_v39 = vpop.eup %2160  ;;  %1732 = vst [vmem:[%s2709_s21 + $0x398] sm:$0xff] %v1056_v2  ;;  %v995_v16 = vmul.f32 0.5, %v2159_v59  ;;  %v1202_v36 = vadd.f32 %v3267_v4, %v1137_v35  ;;  %v1203_v31 = vadd.f32 %v3267_v4, %v1138_v54  ;;  %v1204_v17 = vadd.f32 %v3267_v4, %v1139_v63 }
  0xfe   : > { %v2163_v3 = vpop.eup %2162  ;;  %1733 = vst [vmem:[%s2709_s21 + $0x3a0] sm:$0xff] %v1057_v28  ;;  %v1058_v20 = vadd.f32 0.5, %v994_v10  ;;  %v996_v46 = vmul.f32 0.5, %v2161_v39  ;;  %2178 = vtanh.f32 %v1200_v26  ;;  %v1140_v45 = vmul.f32 %v3264_v41, %v2596_v21 }
  0xff   : > { %v2165_v40 = vpop.eup %2164  ;;  %v1059_v15 = vadd.f32 0.5, %v995_v16  ;;  %v997_v33 = vmul.f32 0.5, %v2163_v3  ;;  %2180 = vtanh.f32 %v1201_v58  ;;  %v1141_v35 = vmul.f32 %v3264_v41, %v2598_v22 }
 0x100   : > { %1734 = vst [vmem:[%s2709_s21 + $0x3a8] sm:$0xff] %v1058_v20  ;;  %v1060_v2 = vadd.f32 0.5, %v996_v46  ;;  %v998_v54 = vmul.f32 0.5, %v2165_v40  ;;  %2182 = vtanh.f32 %v1202_v36  ;;  %v1205_v63 = vadd.f32 %v3267_v4, %v1140_v45 }
 0x101   : > { %1735 = vst [vmem:[%s2709_s21 + $0x3b0] sm:$0xff] %v1059_v15  ;;  %v1061_v59 = vadd.f32 0.5, %v997_v33  ;;  %2184 = vtanh.f32 %v1203_v31  ;;  %v1206_v21 = vadd.f32 %v3267_v4, %v1141_v35  ;;  %v1142_v28 = vmul.f32 %v3264_v41, %v2600_v23 }
 0x102   : > { %v2167_v10 = vpop.eup %2166  ;;  %1736 = vst [vmem:[%s2709_s21 + $0x3b8] sm:$0xff] %v1060_v2  ;;  %v1062_v26 = vadd.f32 0.5, %v998_v54  ;;  %2186 = vtanh.f32 %v1204_v17  ;;  %v1143_v22 = vmul.f32 %v3264_v41, %v2632_v49  ;;  %v1144_v58 = vmul.f32 %v3264_v41, %v2634_v50 }
 0x103   : > { %v2169_v39 = vpop.eup %2168  ;;  %1737 = vst [vmem:[%s2709_s21 + $0x3c0] sm:$0xff] %v1061_v59  ;;  %v999_v16 = vmul.f32 0.5, %v2167_v10  ;;  %2188 = vtanh.f32 %v1205_v63  ;;  %v1207_v36 = vadd.f32 %v3267_v4, %v1142_v28  ;;  %v1145_v31 = vmul.f32 %v3264_v41, %v2636_v51 }
 0x104   : > { %v2171_v23 = vpop.eup %2170  ;;  %1738 = vst [vmem:[%s2709_s21 + $0x3c8] sm:$0xff] %v1062_v26  ;;  %v1000_v3 = vmul.f32 0.5, %v2169_v39  ;;  %2190 = vtanh.f32 %v1206_v21  ;;  %v1208_v17 = vadd.f32 %v3267_v4, %v1143_v22  ;;  %v1209_v49 = vadd.f32 %v3267_v4, %v1144_v58 }
 0x105   : > { %v2173_v20 = vpop.eup %2172  ;;  %v1063_v50 = vadd.f32 0.5, %v999_v16  ;;  %v1001_v46 = vmul.f32 0.5, %v2171_v23  ;;  %2192 = vtanh.f32 %v1207_v36  ;;  %v1210_v45 = vadd.f32 %v3267_v4, %v1145_v31 }
 0x106   : > { %v2175_v40 = vpop.eup %2174  ;;  %v1064_v15 = vadd.f32 0.5, %v1000_v3  ;;  %v1002_v51 = vmul.f32 0.5, %v2173_v20  ;;  %2194 = vtanh.f32 %v1208_v17  ;;  %v1146_v33 = vmul.f32 %v3264_v41, %v2638_v52 }
 0x107   : > { %1739 = vst [vmem:[%s2709_s21 + $0x3d0] sm:$0xff] %v1063_v50  ;;  %v1065_v35 = vadd.f32 0.5, %v1001_v46  ;;  %v1003_v2 = vmul.f32 0.5, %v2175_v40  ;;  %2196 = vtanh.f32 %v1209_v49  ;;  %v1147_v54 = vmul.f32 %v3264_v41, %v2640_v53 }
 0x108   : > { %v2177_v63 = vpop.eup %2176  ;;  %1740 = vst [vmem:[%s2709_s21 + $0x3d8] sm:$0xff] %v1064_v15  ;;  %v1066_v59 = vadd.f32 0.5, %v1002_v51  ;;  %2198 = vtanh.f32 %v1210_v45  ;;  %v1211_v21 = vadd.f32 %v3267_v4, %v1146_v33  ;;  %v1148_v28 = vmul.f32 %v3264_v41, %v2646_v56 }
 0x109   : > { %1741 = vst [vmem:[%s2709_s21 + $0x3e0] sm:$0xff] %v1065_v35  ;;  %v1067_v52 = vadd.f32 0.5, %v1003_v2  ;;  %v1004_v10 = vmul.f32 0.5, %v2177_v63  ;;  %v1212_v26 = vadd.f32 %v3267_v4, %v1147_v54  ;;  %v1149_v22 = vmul.f32 %v3264_v41, %v2664_v5 }
 0x10a   : > { %1742 = vst [vmem:[%s2709_s21 + $0x3e8] sm:$0xff] %v1066_v59  ;;  %2200 = vtanh.f32 %v1211_v21  ;;  %v1213_v53 = vadd.f32 %v3267_v4, %v1148_v28  ;;  %v1150_v58 = vmul.f32 %v3264_v41, %v2669_v11  ;;  %v1151_v39 = vmul.f32 %v3264_v41, %v2671_v13 }
 0x10b   : > { %v2179_v56 = vpop.eup %2178  ;;  %1743 = vst [vmem:[%s2709_s21 + $0x3f0] sm:$0xff] %v1067_v52  ;;  %v1068_v16 = vadd.f32 0.5, %v1004_v10  ;;  %2202 = vtanh.f32 %v1212_v26  ;;  %v1214_v36 = vadd.f32 %v3267_v4, %v1149_v22  ;;  %v1152_v5 = vmul.f32 %v3264_v41, %v2673_v18 }
 0x10c   : > { %v2181_v31 = vpop.eup %2180  ;;  %v1328_v23 = vmul.f32 0.5, %v2179_v56  ;;  %2204 = vtanh.f32 %v1213_v53  ;;  %v1215_v3 = vadd.f32 %v3267_v4, %v1150_v58  ;;  %v1216_v17 = vadd.f32 %v3267_v4, %v1151_v39 }
 0x10d   : > { %v2183_v11 = vpop.eup %2182  ;;  %1744 = vst [vmem:[%s2709_s21 + $0x3f8] sm:$0xff] %v1068_v16  ;;  %v1329_v13 = vmul.f32 0.5, %v2181_v31  ;;  %2206 = vtanh.f32 %v1214_v36  ;;  %v1217_v49 = vadd.f32 %v3267_v4, %v1152_v5  ;;  %v1153_v20 = vmul.f32 %v3264_v41, %v2675_v24 }
 0x10e   : > { %v2185_v50 = vpop.eup %2184  ;;  %v1392_v46 = vadd.f32 0.5, %v1328_v23  ;;  %v1330_v18 = vmul.f32 0.5, %v2183_v11  ;;  %2208 = vtanh.f32 %v1215_v3  ;;  %v1154_v45 = vmul.f32 %v3264_v41, %v2681_v27 }
 0x10f   : > { %v2187_v40 = vpop.eup %2186  ;;  %v1393_v15 = vadd.f32 0.5, %v1329_v13  ;;  %v1331_v51 = vmul.f32 0.5, %v2185_v50  ;;  %2210 = vtanh.f32 %v1216_v17  ;;  %v1218_v33 = vadd.f32 %v3267_v4, %v1153_v20 }
 0x110   : > { %v2189_v35 = vpop.eup %2188  ;;  %1745 = vst [vmem:[%s2709_s21 + $0x400] sm:$0xff] %v1392_v46  ;;  %v1394_v2 = vadd.f32 0.5, %v1330_v18  ;;  %v1332_v54 = vmul.f32 0.5, %v2187_v40  ;;  %2212 = vtanh.f32 %v1217_v49  ;;  %v1219_v24 = vadd.f32 %v3267_v4, %v1154_v45 }
 0x111   : > { %v2191_v63 = vpop.eup %2190  ;;  %1746 = vst [vmem:[%s2709_s21 + $0x408] sm:$0xff] %v1393_v15  ;;  %v1395_v59 = vadd.f32 0.5, %v1331_v51  ;;  %v1333_v21 = vmul.f32 0.5, %v2189_v35  ;;  %2214 = vtanh.f32 %v1218_v33  ;;  %v1155_v27 = vmul.f32 %v3264_v41, %v2700_v44 }
 0x112   : > { %v2193_v28 = vpop.eup %2192  ;;  %1747 = vst [vmem:[%s2709_s21 + $0x410] sm:$0xff] %v1394_v2  ;;  %v1396_v52 = vadd.f32 0.5, %v1332_v54  ;;  %v1334_v10 = vmul.f32 0.5, %v2191_v63  ;;  %2216 = vtanh.f32 %v1219_v24  ;;  %v1156_v26 = vmul.f32 %v3264_v41, %v2705_v62 }
 0x113   : > { %v2195_v22 = vpop.eup %2194  ;;  %1748 = vst [vmem:[%s2709_s21 + $0x418] sm:$0xff] %v1395_v59  ;;  %v1397_v53 = vadd.f32 0.5, %v1333_v21  ;;  %v1335_v58 = vmul.f32 0.5, %v2193_v28  ;;  %v1220_v39 = vadd.f32 %v3267_v4, %v1155_v27  ;;  %v1157_v56 = vmul.f32 %v3264_v41, %v2718_v19 }
 0x114   : > { %v2197_v44 = vpop.eup %2196  ;;  %1749 = vst [vmem:[%s2709_s21 + $0x420] sm:$0xff] %v1396_v52  ;;  %v1398_v16 = vadd.f32 0.5, %v1334_v10  ;;  %v1336_v36 = vmul.f32 0.5, %v2195_v22  ;;  %v1221_v5 = vadd.f32 %v3267_v4, %v1156_v26  ;;  %v1158_v62 = vmul.f32 %v3264_v41, %v2727_v42 }
 0x115   : > { %v2199_v31 = vpop.eup %2198  ;;  %1750 = vst [vmem:[%s2709_s21 + $0x428] sm:$0xff] %v1397_v53  ;;  %v1399_v23 = vadd.f32 0.5, %v1335_v58  ;;  %v1337_v3 = vmul.f32 0.5, %v2197_v44  ;;  %2218 = vtanh.f32 %v1220_v39  ;;  %v1222_v17 = vadd.f32 %v3267_v4, %v1157_v56 }
 0x116   : > { %1751 = vst [vmem:[%s2709_s21 + $0x430] sm:$0xff] %v1398_v16  ;;  %v1400_v19 = vadd.f32 0.5, %v1336_v36  ;;  %v1338_v11 = vmul.f32 0.5, %v2199_v31  ;;  %2220 = vtanh.f32 %v1221_v5  ;;  %v1223_v13 = vadd.f32 %v3267_v4, %v1158_v62 }
 0x117   : > { %v2201_v49 = vpop.eup %2200  ;;  %1752 = vst [vmem:[%s2709_s21 + $0x438] sm:$0xff] %v1399_v23  ;;  %v1401_v20 = vadd.f32 0.5, %v1337_v3  ;;  %2222 = vtanh.f32 %v1222_v17  ;;  %v1159_v42 = vmul.f32 %v3264_v41, %v2731_v47  ;;  %v1160_v50 = vmul.f32 %v3264_v41, %v2742_v6 }
 0x118   : > { %v2203_v46 = vpop.eup %2202  ;;  %1753 = vst [vmem:[%s2709_s21 + $0x440] sm:$0xff] %v1400_v19  ;;  %v1402_v18 = vadd.f32 0.5, %v1338_v11  ;;  %v1339_v45 = vmul.f32 0.5, %v2201_v49  ;;  %2224 = vtanh.f32 %v1223_v13  ;;  %v1161_v40 = vmul.f32 %v3264_v41, %v2751_v37 }
 0x119   : > { %v2205_v15 = vpop.eup %2204  ;;  %1754 = vst [vmem:[%s2709_s21 + $0x448] sm:$0xff] %v1401_v20  ;;  %v1340_v51 = vmul.f32 0.5, %v2203_v46  ;;  %v1224_v33 = vadd.f32 %v3267_v4, %v1159_v42  ;;  %v1225_v35 = vadd.f32 %v3267_v4, %v1160_v50  ;;  %v1162_v47 = vmul.f32 %v3264_v41, %v2760_v61 }
 0x11a   : > { %v2207_v6 = vpop.eup %2206  ;;  %1755 = vst [vmem:[%s2709_s21 + $0x450] sm:$0xff] %v1402_v18  ;;  %v1403_v2 = vadd.f32 0.5, %v1339_v45  ;;  %v1341_v54 = vmul.f32 0.5, %v2205_v15  ;;  %v1226_v24 = vadd.f32 %v3267_v4, %v1161_v40  ;;  %v1163_v37 = vmul.f32 %v3264_v41, %v2764_v1 }
 0x11b   : > { %v2209_v63 = vpop.eup %2208  ;;  %v1404_v59 = vadd.f32 0.5, %v1340_v51  ;;  %v1342_v21 = vmul.f32 0.5, %v2207_v6  ;;  %2226 = vtanh.f32 %v1224_v33  ;;  %v1227_v27 = vadd.f32 %v3267_v4, %v1162_v47 }
 0x11c   : > { %v2211_v28 = vpop.eup %2210  ;;  %1756 = vst [vmem:[%s2709_s21 + $0x458] sm:$0xff] %v1403_v2  ;;  %v1405_v61 = vadd.f32 0.5, %v1341_v54  ;;  %v1343_v52 = vmul.f32 0.5, %v2209_v63  ;;  %2228 = vtanh.f32 %v1225_v35  ;;  %v1228_v10 = vadd.f32 %v3267_v4, %v1163_v37  ;;  %v3704_v63 = vld [vmem:[#allocation20_spill] sm:$0xff] }
 0x11d   : > { %v2213_v26 = vpop.eup %2212  ;;  %1757 = vst [vmem:[%s2709_s21 + $0x460] sm:$0xff] %v1404_v59  ;;  %v1406_v22 = vadd.f32 0.5, %v1342_v21  ;;  %v1344_v1 = vmul.f32 0.5, %v2211_v28  ;;  %2230 = vtanh.f32 %v1226_v24  ;;  %v1164_v53 = vmul.f32 %v3264_v41, %v2775_v30 }
 0x11e   : > { %v2215_v58 = vpop.eup %2214  ;;  %1758 = vst [vmem:[%s2709_s21 + $0x468] sm:$0xff] %v1405_v61  ;;  %v1407_v39 = vadd.f32 0.5, %v1343_v52  ;;  %v1345_v56 = vmul.f32 0.5, %v2213_v26  ;;  %2232 = vtanh.f32 %v1227_v27  ;;  %v1165_v44 = vmul.f32 %v3264_v41, %v2777_v32 }
 0x11f   : > { %v2217_v16 = vpop.eup %2216  ;;  %1759 = vst [vmem:[%s2709_s21 + $0x470] sm:$0xff] %v1406_v22  ;;  %v1408_v36 = vadd.f32 0.5, %v1344_v1  ;;  %v1346_v5 = vmul.f32 0.5, %v2215_v58  ;;  %2234 = vtanh.f32 %v1228_v10  ;;  %v1229_v62 = vadd.f32 %v3267_v4, %v1164_v53  ;;  %v3706_v58 = vld [vmem:[#allocation22_spill] sm:$0xff] }
 0x120   : > { %1760 = vst [vmem:[%s2709_s21 + $0x478] sm:$0xff] %v1407_v39  ;;  %v1409_v31 = vadd.f32 0.5, %v1345_v56  ;;  %v1347_v30 = vmul.f32 0.5, %v2217_v16  ;;  %v1230_v23 = vadd.f32 %v3267_v4, %v1165_v44  ;;  %v1166_v3 = vmul.f32 %v3264_v41, %v2781_v34 }
 0x121   : > { %1761 = vst [vmem:[%s2709_s21 + $0x480] sm:$0xff] %v1408_v36  ;;  %v1410_v17 = vadd.f32 0.5, %v1346_v5  ;;  %2236 = vtanh.f32 %v1229_v62  ;;  %v1167_v32 = vmul.f32 %v3264_v41, %v2790_v48  ;;  %v1168_v19 = vmul.f32 %v3264_v41, %v2795_v57 }
 0x122   : > { %v2219_v11 = vpop.eup %2218  ;;  %1762 = vst [vmem:[%s2709_s21 + $0x488] sm:$0xff] %v1409_v31  ;;  %v1411_v13 = vadd.f32 0.5, %v1347_v30  ;;  %2238 = vtanh.f32 %v1230_v23  ;;  %v1231_v49 = vadd.f32 %v3267_v4, %v1166_v3  ;;  %v1169_v20 = vmul.f32 %v3264_v41, %v2802_v8  ;;  %v3707_v3 = vld [vmem:[#allocation23_spill] sm:$0xff] }
 0x123   : > { %v2221_v34 = vpop.eup %2220  ;;  %1763 = vst [vmem:[%s2709_s21 + $0x490] sm:$0xff] %v1410_v17  ;;  %v1348_v42 = vmul.f32 0.5, %v2219_v11  ;;  %v1232_v50 = vadd.f32 %v3267_v4, %v1167_v32  ;;  %v1233_v46 = vadd.f32 %v3267_v4, %v1168_v19  ;;  %v1170_v48 = vmul.f32 %v3264_v41, %v2807_v25  ;;  %v3708_v32 = vld [vmem:[#allocation24_spill] sm:$0xff] }
 0x124   : > { %v2223_v57 = vpop.eup %2222  ;;  %1764 = vst [vmem:[%s2709_s21 + $0x498] sm:$0xff] %v1411_v13  ;;  %v1349_v18 = vmul.f32 0.5, %v2221_v34  ;;  %2240 = vtanh.f32 %v1231_v49  ;;  %v1234_v45 = vadd.f32 %v3267_v4, %v1169_v20  ;;  %v1171_v8 = vmul.f32 %v3264_v41, %v2820_v55 }
 0x125   : > { %v2225_v40 = vpop.eup %2224  ;;  %v1412_v15 = vadd.f32 0.5, %v1348_v42  ;;  %v1350_v51 = vmul.f32 0.5, %v2223_v57  ;;  %2242 = vtanh.f32 %v1232_v50  ;;  %v1235_v33 = vadd.f32 %v3267_v4, %v1170_v48 }
 0x126   : > { %v1413_v35 = vadd.f32 0.5, %v1349_v18  ;;  %v1351_v25 = vmul.f32 0.5, %v2225_v40  ;;  %2244 = vtanh.f32 %v1233_v46  ;;  %v1236_v47 = vadd.f32 %v3267_v4, %v1171_v8  ;;  %v3709_v18 = vld [vmem:[#allocation26_spill] sm:$0xff]  ;;  %v3710_v8 = vld [vmem:[#allocation27_spill] sm:$0xff] }
 0x127   : > { %1765 = vst [vmem:[%s2709_s21 + $0x4a0] sm:$0xff] %v1412_v15  ;;  %v1414_v6 = vadd.f32 0.5, %v1350_v51  ;;  %2246 = vtanh.f32 %v1234_v45  ;;  %v1172_v55 = vmul.f32 %v3264_v41, %v2822_v0  ;;  %v1173_v2 = vmul.f32 %v3264_v41, %v2827_v9 }
 0x128   : > { %v2227_v54 = vpop.eup %2226  ;;  %1766 = vst [vmem:[%s2709_s21 + $0x4a8] sm:$0xff] %v1413_v35  ;;  %v1415_v24 = vadd.f32 0.5, %v1351_v25  ;;  %2248 = vtanh.f32 %v1235_v33  ;;  %v1174_v37 = vmul.f32 %v3264_v41, %v2832_v12  ;;  %v1175_v59 = vmul.f32 %v3264_v41, %v3704_v63  ;;  %v3705_v12 = vld [vmem:[#allocation21_spill] sm:$0xff]  ;;  %v3711_v33 = vld [vmem:[#allocation28_spill] sm:$0xff] }
 0x129   : > { %v2229_v21 = vpop.eup %2228  ;;  %1767 = vst [vmem:[%s2709_s21 + $0x4b0] sm:$0xff] %v1414_v6  ;;  %v1352_v27 = vmul.f32 0.5, %v2227_v54  ;;  %2250 = vtanh.f32 %v1236_v47  ;;  %v1237_v28 = vadd.f32 %v3267_v4, %v1172_v55  ;;  %v1238_v0 = vadd.f32 %v3267_v4, %v1173_v2 }
 0x12a   : > { %v2231_v61 = vpop.eup %2230  ;;  %1768 = vst [vmem:[%s2709_s21 + $0x4b8] sm:$0xff] %v1415_v24  ;;  %v1353_v9 = vmul.f32 0.5, %v2229_v21  ;;  %v1239_v52 = vadd.f32 %v3267_v4, %v1174_v37  ;;  %v1240_v10 = vadd.f32 %v3267_v4, %v1175_v59  ;;  %v1176_v26 = vmul.f32 %v3264_v41, %v3705_v12 }
 0x12b   : > { %v2233_v22 = vpop.eup %2232  ;;  %v1416_v1 = vadd.f32 0.5, %v1352_v27  ;;  %v1354_v53 = vmul.f32 0.5, %v2231_v61  ;;  %2252 = vtanh.f32 %v1237_v28  ;;  %v1177_v39 = vmul.f32 %v3264_v41, %v3706_v58  ;;  %v3712_v27 = vld [vmem:[#allocation29_spill] sm:$0xff] }
 0x12c   : > { %v2235_v56 = vpop.eup %2234  ;;  %v1417_v44 = vadd.f32 0.5, %v1353_v9  ;;  %v1355_v16 = vmul.f32 0.5, %v2233_v22  ;;  %2254 = vtanh.f32 %v1238_v0  ;;  %v1241_v36 = vadd.f32 %v3267_v4, %v1176_v26 }
 0x12d   : > { %1769 = vst [vmem:[%s2709_s21 + $0x4c0] sm:$0xff] %v1416_v1  ;;  %v1418_v5 = vadd.f32 0.5, %v1354_v53  ;;  %v1356_v62 = vmul.f32 0.5, %v2235_v56  ;;  %2256 = vtanh.f32 %v1239_v52  ;;  %v1242_v31 = vadd.f32 %v3267_v4, %v1177_v39  ;;  %v3713_v52 = vld [vmem:[#allocation30_spill] sm:$0xff]  ;;  %v3714_v56 = vld [vmem:[#allocation31_spill] sm:$0xff] }
 0x12e   : > { %v2237_v30 = vpop.eup %2236  ;;  %1770 = vst [vmem:[%s2709_s21 + $0x4c8] sm:$0xff] %v1417_v44  ;;  %v1419_v23 = vadd.f32 0.5, %v1355_v16  ;;  %2258 = vtanh.f32 %v1240_v10  ;;  %v1178_v17 = vmul.f32 %v3264_v41, %v3707_v3  ;;  %v1179_v19 = vmul.f32 %v3264_v41, %v3708_v32 }
 0x12f   : > { %v2239_v11 = vpop.eup %2238  ;;  %1771 = vst [vmem:[%s2709_s21 + $0x4d0] sm:$0xff] %v1418_v5  ;;  %v1420_v13 = vadd.f32 0.5, %v1356_v62  ;;  %v1357_v49 = vmul.f32 0.5, %v2237_v30  ;;  %2260 = vtanh.f32 %v1241_v36  ;;  %v1180_v20 = vmul.f32 %v3264_v41, %v3687_v14  ;;  %v3715_v62 = vld [vmem:[#allocation32_spill] sm:$0xff] }
 0x130   : > { %1772 = vst [vmem:[%s2709_s21 + $0x4d8] sm:$0xff] %v1419_v23  ;;  %v1358_v34 = vmul.f32 0.5, %v2239_v11  ;;  %2262 = vtanh.f32 %v1242_v31  ;;  %v1243_v42 = vadd.f32 %v3267_v4, %v1178_v17  ;;  %v1244_v50 = vadd.f32 %v3267_v4, %v1179_v19 }
 0x131   : > { %v2241_v46 = vpop.eup %2240  ;;  %1773 = vst [vmem:[%s2709_s21 + $0x4e0] sm:$0xff] %v1420_v13  ;;  %v1421_v48 = vadd.f32 0.5, %v1357_v49  ;;  %v1245_v57 = vadd.f32 %v3267_v4, %v1180_v20  ;;  %v1181_v45 = vmul.f32 %v3264_v41, %v3709_v18  ;;  %v1182_v14 = vmul.f32 %v3264_v41, %v3710_v8  ;;  %v3716_v13 = vld [vmem:[#allocation33_spill] sm:$0xff] }
 0x132   : > { %v2243_v40 = vpop.eup %2242  ;;  %v1422_v15 = vadd.f32 0.5, %v1358_v34  ;;  %v1359_v51 = vmul.f32 0.5, %v2241_v46  ;;  %2264 = vtanh.f32 %v1243_v42  ;;  %v1183_v35 = vmul.f32 %v3264_v41, %v3711_v33 }
 0x133   : > { %v2245_v25 = vpop.eup %2244  ;;  %1774 = vst [vmem:[%s2709_s21 + $0x4e8] sm:$0xff] %v1421_v48  ;;  %v1360_v47 = vmul.f32 0.5, %v2243_v40  ;;  %2266 = vtanh.f32 %v1244_v50  ;;  %v1246_v6 = vadd.f32 %v3267_v4, %v1181_v45  ;;  %v1247_v55 = vadd.f32 %v3267_v4, %v1182_v14  ;;  %v3717_v50 = vld [vmem:[#allocation34_spill] sm:$0xff] }
 0x134   : > { %v2247_v2 = vpop.eup %2246  ;;  %1775 = vst [vmem:[%s2709_s21 + $0x4f0] sm:$0xff] %v1422_v15  ;;  %v1423_v54 = vadd.f32 0.5, %v1359_v51  ;;  %v1361_v24 = vmul.f32 0.5, %v2245_v25  ;;  %2268 = vtanh.f32 %v1245_v57  ;;  %v1248_v37 = vadd.f32 %v3267_v4, %v1183_v35 }
 0x135   : > { %v2249_v63 = vpop.eup %2248  ;;  %v1424_v59 = vadd.f32 0.5, %v1360_v47  ;;  %v1362_v21 = vmul.f32 0.5, %v2247_v2  ;;  %2270 = vtanh.f32 %v1246_v6  ;;  %v1184_v28 = vmul.f32 %v3264_v41, %v3712_v27 }
 0x136   : > { %v2251_v0 = vpop.eup %2250  ;;  %1776 = vst [vmem:[%s2709_s21 + $0x4f8] sm:$0xff] %v1423_v54  ;;  %v1425_v61 = vadd.f32 0.5, %v1361_v24  ;;  %v1363_v9 = vmul.f32 0.5, %v2249_v63  ;;  %2272 = vtanh.f32 %v1247_v55  ;;  %v1185_v10 = vmul.f32 %v3264_v41, %v3713_v52  ;;  %v3718_v55 = vld [vmem:[#allocation37_spill] sm:$0xff] }
 0x137   : > { %1777 = vst [vmem:[%s2709_s21 + $0x500] sm:$0xff] %v1424_v59  ;;  %v1426_v12 = vadd.f32 0.5, %v1362_v21  ;;  %v1364_v26 = vmul.f32 0.5, %v2251_v0  ;;  %2274 = vtanh.f32 %v1248_v37  ;;  %v1249_v22 = vadd.f32 %v3267_v4, %v1184_v28  ;;  %v3720_v0 = vld [vmem:[#allocation39_spill] sm:$0xff] }
 0x138   : > { %v2253_v1 = vpop.eup %2252  ;;  %1778 = vst [vmem:[%s2709_s21 + $0x508] sm:$0xff] %v1425_v61  ;;  %v1427_v53 = vadd.f32 0.5, %v1363_v9  ;;  %v1250_v58 = vadd.f32 %v3267_v4, %v1185_v10  ;;  %v1186_v39 = vmul.f32 %v3264_v41, %v2913_v7  ;;  %v1187_v44 = vmul.f32 %v3264_v41, %v3714_v56 }
 0x139   : > { %v2255_v16 = vpop.eup %2254  ;;  %1779 = vst [vmem:[%s2709_s21 + $0x510] sm:$0xff] %v1426_v12  ;;  %v1428_v36 = vadd.f32 0.5, %v1364_v26  ;;  %v1365_v5 = vmul.f32 0.5, %v2253_v1  ;;  %2276 = vtanh.f32 %v1249_v22  ;;  %v1188_v31 = vmul.f32 %v3264_v41, %v3715_v62 }
 0x13a   : > { %v2257_v30 = vpop.eup %2256  ;;  %1780 = vst [vmem:[%s2709_s21 + $0x518] sm:$0xff] %v1427_v53  ;;  %v1366_v23 = vmul.f32 0.5, %v2255_v16  ;;  %2278 = vtanh.f32 %v1250_v58  ;;  %v1251_v3 = vadd.f32 %v3267_v4, %v1186_v39  ;;  %v1252_v7 = vadd.f32 %v3267_v4, %v1187_v44 }
 0x13b   : > { %v2259_v17 = vpop.eup %2258  ;;  %1781 = vst [vmem:[%s2709_s21 + $0x520] sm:$0xff] %v1428_v36  ;;  %v1429_v32 = vadd.f32 0.5, %v1365_v5  ;;  %v1367_v19 = vmul.f32 0.5, %v2257_v30  ;;  %v1253_v11 = vadd.f32 %v3267_v4, %v1188_v31  ;;  %v1189_v49 = vmul.f32 %v3264_v41, %v3716_v13  ;;  %v3721_v36 = vld [vmem:[#allocation40_spill] sm:$0xff] }
 0x13c   : > { %v2261_v20 = vpop.eup %2260  ;;  %v1430_v34 = vadd.f32 0.5, %v1366_v23  ;;  %v1368_v42 = vmul.f32 0.5, %v2259_v17  ;;  %2280 = vtanh.f32 %v1251_v3  ;;  %v1190_v46 = vmul.f32 %v3264_v41, %v3717_v50 }
 0x13d   : > { %v2263_v48 = vpop.eup %2262  ;;  %1782 = vst [vmem:[%s2709_s21 + $0x528] sm:$0xff] %v1429_v32  ;;  %v1431_v57 = vadd.f32 0.5, %v1367_v19  ;;  %v1369_v18 = vmul.f32 0.5, %v2261_v20  ;;  %2282 = vtanh.f32 %v1252_v7  ;;  %v1254_v45 = vadd.f32 %v3267_v4, %v1189_v49 }
 0x13e   : > { %1783 = vst [vmem:[%s2709_s21 + $0x530] sm:$0xff] %v1430_v34  ;;  %v1432_v8 = vadd.f32 0.5, %v1368_v42  ;;  %v1370_v14 = vmul.f32 0.5, %v2263_v48  ;;  %2284 = vtanh.f32 %v1253_v11  ;;  %v1255_v40 = vadd.f32 %v3267_v4, %v1190_v46 }
 0x13f   : > { %v2265_v15 = vpop.eup %2264  ;;  %1784 = vst [vmem:[%s2709_s21 + $0x538] sm:$0xff] %v1431_v57  ;;  %v1433_v51 = vadd.f32 0.5, %v1369_v18  ;;  %2286 = vtanh.f32 %v1254_v45  ;;  %v1191_v33 = vmul.f32 %v3264_v41, %v3696_v29  ;;  %v1192_v35 = vmul.f32 %v3264_v41, %v3697_v38  ;;  %v3719_v29 = vld [vmem:[#allocation38_spill] sm:$0xff] }
 0x140   : > { %v2267_v25 = vpop.eup %2266  ;;  %1785 = vst [vmem:[%s2709_s21 + $0x540] sm:$0xff] %v1432_v8  ;;  %v1434_v47 = vadd.f32 0.5, %v1370_v14  ;;  %v1371_v6 = vmul.f32 0.5, %v2265_v15  ;;  %2288 = vtanh.f32 %v1255_v40  ;;  %v1193_v2 = vmul.f32 %v3264_v41, %v3718_v55 }
 0x141   : > { %v2269_v54 = vpop.eup %2268  ;;  %1786 = vst [vmem:[%s2709_s21 + $0x548] sm:$0xff] %v1433_v51  ;;  %v1372_v24 = vmul.f32 0.5, %v2267_v25  ;;  %v1256_v37 = vadd.f32 %v3267_v4, %v1191_v33  ;;  %v1257_v63 = vadd.f32 %v3267_v4, %v1192_v35  ;;  %v1194_v59 = vmul.f32 %v3264_v41, %v3719_v29 }
 0x142   : > { %v2271_v38 = vpop.eup %2270  ;;  %1787 = vst [vmem:[%s2709_s21 + $0x550] sm:$0xff] %v1434_v47  ;;  %v1435_v21 = vadd.f32 0.5, %v1371_v6  ;;  %v1373_v27 = vmul.f32 0.5, %v2269_v54  ;;  %v1258_v28 = vadd.f32 %v3267_v4, %v1193_v2  ;;  %v1195_v61 = vmul.f32 %v3264_v41, %v3720_v0 }
 0x143   : > { %v2273_v9 = vpop.eup %2272  ;;  %v1436_v52 = vadd.f32 0.5, %v1372_v24  ;;  %v1374_v10 = vmul.f32 0.5, %v2271_v38  ;;  %2290 = vtanh.f32 %v1256_v37  ;;  %v1259_v12 = vadd.f32 %v3267_v4, %v1194_v59 }
 0x144   : > { %v2275_v26 = vpop.eup %2274  ;;  %1788 = vst [vmem:[%s2709_s21 + $0x558] sm:$0xff] %v1435_v21  ;;  %v1437_v22 = vadd.f32 0.5, %v1373_v27  ;;  %v1375_v1 = vmul.f32 0.5, %v2273_v9  ;;  %2292 = vtanh.f32 %v1257_v63  ;;  %v1260_v53 = vadd.f32 %v3267_v4, %v1195_v61 }
 0x145   : > { %1789 = vst [vmem:[%s2709_s21 + $0x560] sm:$0xff] %v1436_v52  ;;  %v1438_v58 = vadd.f32 0.5, %v1374_v10  ;;  %v1376_v39 = vmul.f32 0.5, %v2275_v26  ;;  %2294 = vtanh.f32 %v1258_v28  ;;  %v1196_v56 = vmul.f32 %v3264_v41, %v2981_v43 }
 0x146   : > { %v2277_v44 = vpop.eup %2276  ;;  %1790 = vst [vmem:[%s2709_s21 + $0x568] sm:$0xff] %v1437_v22  ;;  %v1439_v16 = vadd.f32 0.5, %v1375_v1  ;;  %2296 = vtanh.f32 %v1259_v12  ;;  %v1197_v5 = vmul.f32 %v3264_v41, %v3721_v36  ;;  %v1198_v62 = vmul.f32 %v3264_v41, %v3701_v60 }
 0x147   : > { %v2279_v31 = vpop.eup %2278  ;;  %1791 = vst [vmem:[%s2709_s21 + $0x570] sm:$0xff] %v1438_v58  ;;  %v1440_v30 = vadd.f32 0.5, %v1376_v39  ;;  %v1377_v23 = vmul.f32 0.5, %v2277_v44  ;;  %2298 = vtanh.f32 %v1260_v53  ;;  %v1261_v3 = vadd.f32 %v3267_v4, %v1196_v56 }
 0x148   : > { %1792 = vst [vmem:[%s2709_s21 + $0x578] sm:$0xff] %v1439_v16  ;;  %v1378_v43 = vmul.f32 0.5, %v2279_v31  ;;  %v1262_v7 = vadd.f32 %v3267_v4, %v1197_v5  ;;  %v1263_v17 = vadd.f32 %v3267_v4, %v1198_v62 }
 0x149   : > { %v2281_v32 = vpop.eup %2280  ;;  %1793 = vst [vmem:[%s2709_s21 + $0x580] sm:$0xff] %v1440_v30  ;;  %v1441_v19 = vadd.f32 0.5, %v1377_v23  ;;  %2300 = vtanh.f32 %v1261_v3 }
 0x14a   : > { %v2283_v60 = vpop.eup %2282  ;;  %v1442_v41 = vadd.f32 0.5, %v1378_v43  ;;  %v1379_v11 = vmul.f32 0.5, %v2281_v32  ;;  %2302 = vtanh.f32 %v1262_v7 }
 0x14b   : > { %v2285_v13 = vpop.eup %2284  ;;  %1794 = vst [vmem:[%s2709_s21 + $0x588] sm:$0xff] %v1441_v19  ;;  %v1380_v49 = vmul.f32 0.5, %v2283_v60  ;;  %2304 = vtanh.f32 %v1263_v17 }
 0x14c   : > { %v2287_v20 = vpop.eup %2286  ;;  %1795 = vst [vmem:[%s2709_s21 + $0x590] sm:$0xff] %v1442_v41  ;;  %v1443_v34 = vadd.f32 0.5, %v1379_v11  ;;  %v1381_v4 = vmul.f32 0.5, %v2285_v13 }
 0x14d   : > { %v2289_v42 = vpop.eup %2288  ;;  %v1444_v50 = vadd.f32 0.5, %v1380_v49  ;;  %v1382_v46 = vmul.f32 0.5, %v2287_v20 }
 0x14e   : > { %1796 = vst [vmem:[%s2709_s21 + $0x598] sm:$0xff] %v1443_v34  ;;  %v1445_v48 = vadd.f32 0.5, %v1381_v4  ;;  %v1383_v57 = vmul.f32 0.5, %v2289_v42 }
 0x14f   : > { %1797 = vst [vmem:[%s2709_s21 + $0x5a0] sm:$0xff] %v1444_v50  ;;  %v1446_v18 = vadd.f32 0.5, %v1382_v46 }
 0x150   : > { %v2291_v45 = vpop.eup %2290  ;;  %1798 = vst [vmem:[%s2709_s21 + $0x5a8] sm:$0xff] %v1445_v48  ;;  %v1447_v8 = vadd.f32 0.5, %v1383_v57 }
 0x151   : > { %v2293_v14 = vpop.eup %2292  ;;  %1799 = vst [vmem:[%s2709_s21 + $0x5b0] sm:$0xff] %v1446_v18  ;;  %v1384_v40 = vmul.f32 0.5, %v2291_v45 }
 0x152   : > { %v2295_v15 = vpop.eup %2294  ;;  %1800 = vst [vmem:[%s2709_s21 + $0x5b8] sm:$0xff] %v1447_v8  ;;  %v1385_v51 = vmul.f32 0.5, %v2293_v14 }
 0x153   : > { %v2297_v33 = vpop.eup %2296  ;;  %v1448_v35 = vadd.f32 0.5, %v1384_v40  ;;  %v1386_v25 = vmul.f32 0.5, %v2295_v15 }
 0x154   : > { %v2299_v47 = vpop.eup %2298  ;;  %v1449_v6 = vadd.f32 0.5, %v1385_v51  ;;  %v1387_v55 = vmul.f32 0.5, %v2297_v33 }
 0x155   : > { %1801 = vst [vmem:[%s2709_s21 + $0x5c0] sm:$0xff] %v1448_v35  ;;  %v1450_v2 = vadd.f32 0.5, %v1386_v25  ;;  %v1388_v54 = vmul.f32 0.5, %v2299_v47 }
 0x156   : > { %v2301_v24 = vpop.eup %2300  ;;  %1802 = vst [vmem:[%s2709_s21 + $0x5c8] sm:$0xff] %v1449_v6  ;;  %v1451_v37 = vadd.f32 0.5, %v1387_v55 }
 0x157   : > { %v2303_v63 = vpop.eup %2302  ;;  %1803 = vst [vmem:[%s2709_s21 + $0x5d0] sm:$0xff] %v1450_v2  ;;  %v1452_v29 = vadd.f32 0.5, %v1388_v54  ;;  %v1389_v59 = vmul.f32 0.5, %v2301_v24 }
 0x158   : > { %v2305_v38 = vpop.eup %2304  ;;  %1804 = vst [vmem:[%s2709_s21 + $0x5d8] sm:$0xff] %v1451_v37  ;;  %v1390_v21 = vmul.f32 0.5, %v2303_v63 }
 0x159   : > { %1805 = vst [vmem:[%s2709_s21 + $0x5e0] sm:$0xff] %v1452_v29  ;;  %v1453_v27 = vadd.f32 0.5, %v1389_v59  ;;  %v1391_v28 = vmul.f32 0.5, %v2305_v38 }
 0x15a   : > { %v1454_v0 = vadd.f32 0.5, %v1390_v21 }
 0x15b   : > { %1806 = vst [vmem:[%s2709_s21 + $0x5e8] sm:$0xff] %v1453_v27  ;;  %v1455_v61 = vadd.f32 0.5, %v1391_v28 }
 0x15c   : > { %1807 = vst [vmem:[%s2709_s21 + $0x5f0] sm:$0xff] %v1454_v0 }
 0x15d   : > { %1808 = vst [vmem:[%s2709_s21 + $0x5f8] sm:$0xff] %v1455_v61 }
 0x15e   : > { %s1815_s28 = sshll.u32 %s2403_s12, 6  ;;  %s1817_s29 = smul.u32 768, %s2407_s13 }
 0x15f   : > { %s1548_s30 = sshll.u32 %s2709_s21, 4  ;;  %s2425_s7 = smov 8192   ;;  %s1549_s30 = int_to_ptr.vmem [resolvable:$true] %s1548_s30 }
 0x160   : > { %s1535_s3 = sadd.s32 %s1817_s29, %s1815_s28  ;;  %1824 = sst [smem:[#allocation9]] (%p2505_p8), %s2425_s7 }
 0x161   : > { %s1811_s6 = sshll.u32 %s1535_s3, 7  ;;  %s2426_s4 = smov 32768  }
 0x162   : > { %s1537_s16 = scalar_lea.hbm %s3593_s2, %s1811_s6  ;;  %1825 = sst [smem:[#allocation9 + $0x1]] (%p2505_p8), %s2426_s4 }
 0x163   : > { %s2427_s5 = smov 16   ;;  %s2428_s12 = smov 512  }
 0x164   : > { %1826 = sst [smem:[#allocation9 + $0x2]] (%p2505_p8), %s2427_s5  ;;  %s2429_s13 = smov 32  }
 0x165   : > { %1827 = sst [smem:[#allocation9 + $0x3]] (%p2505_p8), %s2428_s12  ;;  %s2430_s8 = smov 131072  }
 0x166   : > { %1828 = sst [smem:[#allocation9 + $0x4]] (%p2505_p8), %s2428_s12  ;;  %s2431_s14 = smov 0  }
 0x167   : > { %1829 = sst [smem:[#allocation9 + $0x5]] (%p2505_p8), %s2429_s13 }
 0x168   : > { %1830 = dma.general (%p2505_p8), %s1549_s30, 24576, %s1537_s16, %s1522_s18, %s2430_s8, [#allocation9], %s2431_s14, 0  }
 0x169 PF: > { %s3722_s19 = sld [smem:[#allocation15_spill]] }
 0x16a   : > { %s3723_s20 = sld [smem:[#allocation13_spill]] }
 0x16b   : > { %s3724_s21 = sld [smem:[#allocation16_spill]] }
 0x16f   : > { %p1847_p3 = scmp.ge.s32.totalorder %s3722_s19, 2 }
 0x170   : > { %s1576_s24 = sand.u32 1, %s3723_s20  }
 0x171   : > { %p3725_p7 = scmp.ne.s32.totalorder %s3724_s21, 0  ;;  %s1577_s25 = scalar_lea.sflag [#allocation4], %s1576_s24 }
 0x173   : > { %p1841_p9 = pnand %p1847_p3, %p3725_p7 }
 0x175   : > { %p1842_p12 = pneg %p1841_p9 }
 0x177   : > { %2386 = dma.done.wait (%p1842_p12), %s1577_s25, 24576  }
 0x178   : > { %2388 = vsyncadd (%p1842_p12), %s1577_s25, 4294942720  ;;  %s19_s16 = sadd.s32 1, %s3722_s19   ;;  %s3726_s26 = smov %s2551_s9 }
 0x179   : > { %p16_p1 = scmp.ge.s32.totalorder %s19_s16, 10   ;;  %s3727_s12 = sld [smem:[#allocation14_spill]] }
 0x17a   : > { %s3728_s14 = sld [smem:[#allocation17_spill]]  ;;  %s3729_s9 = smov %s2395_s10 }
 0x17b   : > { %s3730_s10 = smov %s2399_s11  ;;  %s3731_s11 = smov %s3726_s26 }
 0x17c   : > { %s3732_s13 = smov %s2415_s15  ;;  %s3733_s15 = smov %s3739_s27 }
 0x17d   :  { %18 = sbr.rel (!%p16_p1) target bundleno = 10 (0xa), region = 85 }
 0x182   :  { %1582 = vsyncpa [#allocation3], 1 }
 0x183   :  { %1584 = vsyncpa [#allocation3 + $0x1], 1 }
 0x184   :  { %1585 = vsyncpa [#allocation4], 1 }
 0x185   :  { %1587 = vsyncpa [#allocation4 + $0x1], 1 }
 0x186   :  { %1588 = vsyncpa [#allocation5], 1 }
 0x187   :  { %1590 = vsyncpa [#allocation5 + $0x1], 1 }

</bundles_post_ra>
